<compile_context>
chip_gen: v7x
topology: tpu7x:2x2x1
jax: 0.10.0
libtpu: 0.0.40
codegen_flags: <defaults>
</compile_context>

<pallas_src>
import jax
import jax.numpy as jnp
from jax import lax
from jax.experimental import pallas as pl
from jax.experimental.pallas import tpu as pltpu

BN_EPS = 1e-5
_MIB = 1024 * 1024


# ----------------------------- block-size helpers ----------------------------
def _pick_batch_block(n, per_item_bytes, target_bytes, min_steps=1):
    """Largest divisor t of n with t*per_item_bytes <= target_bytes and at
    least `min_steps` grid steps (falls back to 1)."""
    best = 1
    for t in range(1, n + 1):
        if n % t != 0:
            continue
        if t * per_item_bytes > target_bytes:
            break
        if (n // t) < min_steps:
            continue
        best = t
    return best


def _vmem_limit(block_bytes):
    # 2x for input/output double-buffering plus headroom for in-kernel
    # temporaries; clamped to stay inside every generation's scoped budget.
    return int(min(48 * _MIB, max(16 * _MIB, 4 * block_bytes)))


# -----------------------------------------------------------------------------
# Kernel 1: fused gate kernel.  Single pass over a (TB, C, H, W) block of x
# producing, per image:
#   y_hw (H, W)    : ZPool over C + 5-tap conv along H   (hw branch)
#   y_cw (C, 1, W) : ZPool over H + 5-tap conv along C   (cw branch)
#   y_hc (C, H, 1) : ZPool over W + 5-tap conv along H   (hc branch)
# w_ref (SMEM, 30): [hw | cw | hc], each 10 = [max taps 0..4, mean taps 0..4].
# -----------------------------------------------------------------------------
def _fused_gate_kernel(x_ref, w_ref, yhw_ref, ycw_ref, yhc_ref):
    tb = x_ref.shape[0]

    def conv5(p_max, p_mean, axis, base):
        # 5-tap cross-correlation along `axis`, zero padding 2 on both sides
        # (matches PyTorch Conv2d(2, 1, (5,1), padding=(2,0)) on [max, mean]).
        length = p_max.shape[axis]
        pad_shape = list(p_max.shape)
        pad_shape[axis] = 2
        z = jnp.zeros(pad_shape, jnp.float32)
        q0 = jnp.concatenate([z, p_max, z], axis=axis)
        q1 = jnp.concatenate([z, p_mean, z], axis=axis)
        acc = jnp.zeros(p_max.shape, jnp.float32)
        for k in range(5):
            s0 = lax.slice_in_dim(q0, k, k + length, axis=axis)
            s1 = lax.slice_in_dim(q1, k, k + length, axis=axis)
            acc = acc + w_ref[base + k] * s0 + w_ref[base + 5 + k] * s1
        return acc

    for b in range(tb):                                   # static unroll
        xv = x_ref[b].astype(jnp.float32)                 # (C, H, W)

        # hw branch: pool over C, conv along H (sublane axis of the 2-D map).
        yhw_ref[b] = conv5(jnp.max(xv, axis=0),
                           jnp.mean(xv, axis=0),
                           axis=0, base=0).astype(yhw_ref.dtype)

        # cw branch: pool over H (keepdims -> (C,1,W)), conv along C (axis 0).
        ycw_ref[b] = conv5(jnp.max(xv, axis=1, keepdims=True),
                           jnp.mean(xv, axis=1, keepdims=True),
                           axis=0, base=10).astype(ycw_ref.dtype)

        # hc branch: pool over W (keepdims -> (C,H,1)), conv along H (axis 1).
        yhc_ref[b] = conv5(jnp.max(xv, axis=2, keepdims=True),
                           jnp.mean(xv, axis=2, keepdims=True),
                           axis=1, base=20).astype(yhc_ref.dtype)


def _fused_gate(x, w_flat, tb):
    n, c, h, w = x.shape
    block_bytes = 4 * tb * (c * h * w + h * w + c * w + c * h)
    flops = 2 * n * c * h * w + 22 * n * (h * w + c * w + c * h)
    bytes_accessed = 4 * (x.size + n * (h * w + c * w + c * h) + 30)
    return pl.pallas_call(
        _fused_gate_kernel,
        out_shape=(jax.ShapeDtypeStruct((n, h, w), jnp.float32),
                   jax.ShapeDtypeStruct((n, c, 1, w), jnp.float32),
                   jax.ShapeDtypeStruct((n, c, h, 1), jnp.float32)),
        grid=(n // tb,),
        in_specs=[
            pl.BlockSpec((tb, c, h, w), lambda i: (i, 0, 0, 0)),
            pl.BlockSpec(memory_space=pltpu.MemorySpace.SMEM),   # 30 conv taps
        ],
        out_specs=(
            pl.BlockSpec((tb, h, w), lambda i: (i, 0, 0)),
            pl.BlockSpec((tb, c, 1, w), lambda i: (i, 0, 0, 0)),
            pl.BlockSpec((tb, c, h, 1), lambda i: (i, 0, 0, 0)),
        ),
        compiler_params=pltpu.CompilerParams(
            dimension_semantics=("parallel",),
            vmem_limit_bytes=_vmem_limit(block_bytes)),
        cost_estimate=pl.CostEstimate(flops=flops, transcendentals=0,
                                      bytes_accessed=bytes_accessed),
    )(x, w_flat)


def _bn_fold(y, gamma, beta):
    """Fold training-mode BatchNorm2d(1) (batch stats, biased variance) into
    y*s + b.  Two-pass mean / mean((y-mean)^2) for numerical stability."""
    mean = jnp.mean(y)
    var = jnp.mean(jnp.square(y - mean))
    g = jnp.asarray(gamma, jnp.float32).reshape(())
    bt = jnp.asarray(beta, jnp.float32).reshape(())
    s = g * lax.rsqrt(var + BN_EPS)
    return s, bt - mean * s


# -----------------------------------------------------------------------------
# Kernel 2: combine kernel (batch- and channel-tiled).
#   out = x * ( w1*sig(y_hw*s1+b1) + w2*sig(y_cw*s2+b2) + w3*sig(y_hc*s3+b3) )
# with the gate maps broadcast over C / H / W via implicit broadcasting.
# -----------------------------------------------------------------------------
def _combine_kernel(p_ref, x_ref, yhw_ref, ycw_ref, yhc_ref, o_ref):
    # p_ref (SMEM, 9): [s_hw, b_hw, s_cw, b_cw, s_hc, b_hc, w1, w2, w3]
    def gate(y, s, b):                                    # folded BN + sigmoid
        z = y.astype(jnp.float32) * s + b
        return 1.0 / (1.0 + jnp.exp(-z))

    g_hw = gate(yhw_ref[...], p_ref[0], p_ref[1])[:, None, :, :]  # (TB,1,H,W)
    g_cw = gate(ycw_ref[...], p_ref[2], p_ref[3])                 # (TB,TC,1,W)
    g_hc = gate(yhc_ref[...], p_ref[4], p_ref[5])                 # (TB,TC,H,1)

    mix = p_ref[6] * g_hw                 # broadcasts lazily up to (TB,TC,H,W)
    mix = mix + p_ref[7] * g_cw
    mix = mix + p_ref[8] * g_hc
    o_ref[...] = (x_ref[...].astype(jnp.float32) * mix).astype(o_ref.dtype)


def _combine(x, y_hw, y_cw, y_hc, pvec, tb, tc):
    n, c, h, w = x.shape
    block_bytes = 4 * tb * (2 * tc * h * w + h * w + tc * w + tc * h)
    flops = 8 * n * c * h * w
    transcendentals = n * (h * w + c * w + c * h)
    bytes_accessed = 4 * (2 * x.size + y_hw.size + y_cw.size + y_hc.size + 9)
    return pl.pallas_call(
        _combine_kernel,
        out_shape=jax.ShapeDtypeStruct((n, c, h, w), x.dtype),
        grid=(n // tb, c // tc),
        in_specs=[
            pl.BlockSpec(memory_space=pltpu.MemorySpace.SMEM),      # 9 scalars
            pl.BlockSpec((tb, tc, h, w), lambda i, j: (i, j, 0, 0)),
            pl.BlockSpec((tb, h, w), lambda i, j: (i, 0, 0)),
            pl.BlockSpec((tb, tc, 1, w), lambda i, j: (i, j, 0, 0)),
            pl.BlockSpec((tb, tc, h, 1), lambda i, j: (i, j, 0, 0)),
        ],
        out_specs=pl.BlockSpec((tb, tc, h, w), lambda i, j: (i, j, 0, 0)),
        compiler_params=pltpu.CompilerParams(
            dimension_semantics=("parallel", "parallel"),
            vmem_limit_bytes=_vmem_limit(block_bytes)),
        cost_estimate=pl.CostEstimate(flops=flops,
                                      transcendentals=transcendentals,
                                      bytes_accessed=bytes_accessed),
    )(pvec, x, y_hw, y_cw, y_hc)


# --------------------------------- forward -----------------------------------
def triplet_attention_forward(x, params):
    """TripletAttention forward (training-mode BatchNorm batch statistics).
    x: (N, C, H, W) float32.  params: dict of TripletAttention weights."""
    n, c, h, w = x.shape
    xf = x.astype(jnp.float32)

    # Pack the three (1,2,5,1) Conv2d weights into one flat SMEM vector:
    # [hw | cw | hc], each 10 taps ordered [max-channel 0..4, mean-channel 0..4].
    w_flat = jnp.concatenate([
        params["hw_conv_w"].reshape(-1),
        params["cw_conv_w"].reshape(-1),
        params["hc_conv_w"].reshape(-1),
    ]).astype(jnp.float32)

    # Fused single-pass gate kernel (reads x exactly once).
    img_bytes = 4 * c * h * w
    tb_gate = _pick_batch_block(n, img_bytes, 2 * _MIB, min_steps=min(2, n))
    y_hw, y_cw, y_hc = _fused_gate(xf, w_flat, tb_gate)

    # Fold training-mode BatchNorm2d(1) into per-branch scale/bias.
    s_hw, b_hw = _bn_fold(y_hw, params["hw_bn_gamma"], params["hw_bn_beta"])
    s_cw, b_cw = _bn_fold(y_cw, params["cw_bn_gamma"], params["cw_bn_beta"])
    s_hc, b_hc = _bn_fold(y_hc, params["hc_bn_gamma"], params["hc_bn_beta"])

    pvec = jnp.stack([
        s_hw, b_hw, s_cw, b_cw, s_hc, b_hc,
        jnp.asarray(params["w1"], jnp.float32).reshape(()),
        jnp.asarray(params["w2"], jnp.float32).reshape(()),
        jnp.asarray(params["w3"], jnp.float32).reshape(()),
    ]).astype(jnp.float32)

    # Batch/channel-tiled combine pass.
    tc_comb = _pick_batch_block(c, 4 * h * w, 512 * 1024)
    tb_comb = _pick_batch_block(n, 4 * tc_comb * h * w, 2 * _MIB,
                                min_steps=min(2, n))
    return _combine(xf, y_hw, y_cw, y_hc, pvec, tb_comb, tc_comb)


# ------------------------------- pure-JAX reference --------------------------
def _gate_ref(xb, conv_w, gamma, beta):
    xc = jnp.stack([jnp.max(xb, axis=1), jnp.mean(xb, axis=1)], axis=1)
    y = lax.conv_general_dilated(
        xc, conv_w, window_strides=(1, 1), padding=[(2, 2), (0, 0)],
        dimension_numbers=("NCHW", "OIHW", "NCHW"),
        preferred_element_type=jnp.float32)
    mean = jnp.mean(y)
    var = jnp.mean((y - mean) ** 2)
    yb = (y - mean) * lax.rsqrt(var + BN_EPS) * gamma.reshape(()) + beta.reshape(())
    return xb * jax.nn.sigmoid(yb)


def _triplet_reference(x, p):
    o1 = _gate_ref(jnp.transpose(x, (0, 2, 1, 3)), p["cw_conv_w"],
                   p["cw_bn_gamma"], p["cw_bn_beta"])
    o11 = jnp.transpose(o1, (0, 2, 1, 3))
    o2 = _gate_ref(jnp.transpose(x, (0, 3, 2, 1)), p["hc_conv_w"],
                   p["hc_bn_gamma"], p["hc_bn_beta"])
    o21 = jnp.transpose(o2, (0, 3, 2, 1))
    o3 = _gate_ref(x, p["hw_conv_w"], p["hw_bn_gamma"], p["hw_bn_beta"])
    return (p["w1"].reshape(()) * o3 + p["w2"].reshape(()) * o11
            + p["w3"].reshape(()) * o21)


if __name__ == "__main__":
    N, C, H, W = 2, 4, 16, 16
    keys = jax.random.split(jax.random.PRNGKey(0), 10)
    x = jax.random.normal(keys[0], (N, C, H, W), dtype=jnp.float32)

    params = {
        "cw_conv_w": 0.2 * jax.random.normal(keys[1], (1, 2, 5, 1), jnp.float32),
        "hc_conv_w": 0.2 * jax.random.normal(keys[2], (1, 2, 5, 1), jnp.float32),
        "hw_conv_w": 0.2 * jax.random.normal(keys[3], (1, 2, 5, 1), jnp.float32),
        "cw_bn_gamma": 1.0 + 0.1 * jax.random.normal(keys[4], (1,), jnp.float32),
        "cw_bn_beta": 0.1 * jax.random.normal(keys[5], (1,), jnp.float32),
        "hc_bn_gamma": 1.0 + 0.1 * jax.random.normal(keys[6], (1,), jnp.float32),
        "hc_bn_beta": 0.1 * jax.random.normal(keys[7], (1,), jnp.float32),
        "hw_bn_gamma": 1.0 + 0.1 * jax.random.normal(keys[8], (1,), jnp.float32),
        "hw_bn_beta": 0.1 * jax.random.normal(keys[9], (1,), jnp.float32),
        "w1": jnp.full((1,), 1.0 / 3.0, jnp.float32),
        "w2": jnp.full((1,), 1.0 / 3.0, jnp.float32),
        "w3": jnp.full((1,), 1.0 / 3.0, jnp.float32),
    }

    fwd = jax.jit(triplet_attention_forward)
    out = jax.block_until_ready(fwd(x, params))

    ref = _triplet_reference(x, params)
    assert out.shape == (N, C, H, W), out.shape
    max_err = float(jnp.max(jnp.abs(out - ref)))
    assert jnp.allclose(out, ref, atol=1e-4, rtol=1e-4), max_err
    print("KERNEL_OK")
</pallas_src>

<mosaic_0001>
module attributes {stable_mosaic.version = 11 : i64} {
  func.func @_fused_gate_kernel(%arg0: i32, %arg1: memref<1x4x16x16xf32, #tpu.memory_space<vmem>>, %arg2: memref<30xf32, #tpu.memory_space<smem>>, %arg3: memref<1x16x16xf32, #tpu.memory_space<vmem>>, %arg4: memref<1x4x1x16xf32, #tpu.memory_space<vmem>>, %arg5: memref<1x4x16x1xf32, #tpu.memory_space<vmem>>) attributes {dimension_semantics = [#tpu.dimension_semantics<parallel>], iteration_bounds = array<i64: 2>, scalar_prefetch = 0 : i64, scratch_operands = 0 : i64, tpu.core_type = #tpu.core_type<tc>, window_params = [{transform_indices = @transform_0, window_bounds = array<i64: 1, 4, 16, 16>}, {transform_indices = @transform_1, window_bounds = array<i64: 30>}, {transform_indices = @transform_2, window_bounds = array<i64: 1, 16, 16>}, {transform_indices = @transform_3, window_bounds = array<i64: 1, 4, 1, 16>}, {transform_indices = @transform_4, window_bounds = array<i64: 1, 4, 16, 1>}]} {
    %c0 = arith.constant 0 : index
    %c0_0 = arith.constant 0 : index
    %c0_1 = arith.constant 0 : index
    %c0_2 = arith.constant 0 : index
    %0 = vector.load %arg1[%c0, %c0_0, %c0_1, %c0_2] : memref<1x4x16x16xf32, #tpu.memory_space<vmem>>, vector<1x4x16x16xf32>
    %1 = vector.shape_cast %0 : vector<1x4x16x16xf32> to vector<4x16x16xf32>
    %cst = arith.constant dense<0xFF800000> : vector<16x16xf32>
    %2 = vector.multi_reduction <maximumf>, %1, %cst [0] : vector<4x16x16xf32> to vector<16x16xf32>
    %cst_3 = arith.constant dense<0.000000e+00> : vector<16x16xf32>
    %3 = vector.multi_reduction <add>, %1, %cst_3 [0] : vector<4x16x16xf32> to vector<16x16xf32>
    %cst_4 = arith.constant 4.000000e+00 : f32
    %4 = vector.broadcast %cst_4 : f32 to vector<16x16xf32>
    %5 = arith.divf %3, %4 : vector<16x16xf32>
    %cst_5 = arith.constant 0.000000e+00 : f32
    %6 = vector.broadcast %cst_5 : f32 to vector<2x16xf32>
    %7 = tpu.concatenate %6, %2, %6 in 0 : vector<2x16xf32>, vector<16x16xf32>, vector<2x16xf32> -> vector<20x16xf32>
    %8 = tpu.concatenate %6, %5, %6 in 0 : vector<2x16xf32>, vector<16x16xf32>, vector<2x16xf32> -> vector<20x16xf32>
    %cst_6 = arith.constant 0.000000e+00 : f32
    %9 = vector.broadcast %cst_6 : f32 to vector<16x16xf32>
    %10 = vector.extract_strided_slice %7 {offsets = [0, 0], sizes = [16, 16], strides = [1, 1]} : vector<20x16xf32> to vector<16x16xf32>
    %11 = vector.extract_strided_slice %8 {offsets = [0, 0], sizes = [16, 16], strides = [1, 1]} : vector<20x16xf32> to vector<16x16xf32>
    %c0_7 = arith.constant 0 : index
    %12 = memref.load %arg2[%c0_7] : memref<30xf32, #tpu.memory_space<smem>>
    %13 = vector.broadcast %12 : f32 to vector<16x16xf32>
    %14 = arith.mulf %13, %10 : vector<16x16xf32>
    %15 = arith.addf %9, %14 : vector<16x16xf32>
    %c5 = arith.constant 5 : index
    %16 = memref.load %arg2[%c5] : memref<30xf32, #tpu.memory_space<smem>>
    %17 = vector.broadcast %16 : f32 to vector<16x16xf32>
    %18 = arith.mulf %17, %11 : vector<16x16xf32>
    %19 = arith.addf %15, %18 : vector<16x16xf32>
    %20 = vector.extract_strided_slice %7 {offsets = [1, 0], sizes = [16, 16], strides = [1, 1]} : vector<20x16xf32> to vector<16x16xf32>
    %21 = vector.extract_strided_slice %8 {offsets = [1, 0], sizes = [16, 16], strides = [1, 1]} : vector<20x16xf32> to vector<16x16xf32>
    %c1 = arith.constant 1 : index
    %22 = memref.load %arg2[%c1] : memref<30xf32, #tpu.memory_space<smem>>
    %23 = vector.broadcast %22 : f32 to vector<16x16xf32>
    %24 = arith.mulf %23, %20 : vector<16x16xf32>
    %25 = arith.addf %19, %24 : vector<16x16xf32>
    %c6 = arith.constant 6 : index
    %26 = memref.load %arg2[%c6] : memref<30xf32, #tpu.memory_space<smem>>
    %27 = vector.broadcast %26 : f32 to vector<16x16xf32>
    %28 = arith.mulf %27, %21 : vector<16x16xf32>
    %29 = arith.addf %25, %28 : vector<16x16xf32>
    %30 = vector.extract_strided_slice %7 {offsets = [2, 0], sizes = [16, 16], strides = [1, 1]} : vector<20x16xf32> to vector<16x16xf32>
    %31 = vector.extract_strided_slice %8 {offsets = [2, 0], sizes = [16, 16], strides = [1, 1]} : vector<20x16xf32> to vector<16x16xf32>
    %c2 = arith.constant 2 : index
    %32 = memref.load %arg2[%c2] : memref<30xf32, #tpu.memory_space<smem>>
    %33 = vector.broadcast %32 : f32 to vector<16x16xf32>
    %34 = arith.mulf %33, %30 : vector<16x16xf32>
    %35 = arith.addf %29, %34 : vector<16x16xf32>
    %c7 = arith.constant 7 : index
    %36 = memref.load %arg2[%c7] : memref<30xf32, #tpu.memory_space<smem>>
    %37 = vector.broadcast %36 : f32 to vector<16x16xf32>
    %38 = arith.mulf %37, %31 : vector<16x16xf32>
    %39 = arith.addf %35, %38 : vector<16x16xf32>
    %40 = vector.extract_strided_slice %7 {offsets = [3, 0], sizes = [16, 16], strides = [1, 1]} : vector<20x16xf32> to vector<16x16xf32>
    %41 = vector.extract_strided_slice %8 {offsets = [3, 0], sizes = [16, 16], strides = [1, 1]} : vector<20x16xf32> to vector<16x16xf32>
    %c3 = arith.constant 3 : index
    %42 = memref.load %arg2[%c3] : memref<30xf32, #tpu.memory_space<smem>>
    %43 = vector.broadcast %42 : f32 to vector<16x16xf32>
    %44 = arith.mulf %43, %40 : vector<16x16xf32>
    %45 = arith.addf %39, %44 : vector<16x16xf32>
    %c8 = arith.constant 8 : index
    %46 = memref.load %arg2[%c8] : memref<30xf32, #tpu.memory_space<smem>>
    %47 = vector.broadcast %46 : f32 to vector<16x16xf32>
    %48 = arith.mulf %47, %41 : vector<16x16xf32>
    %49 = arith.addf %45, %48 : vector<16x16xf32>
    %50 = vector.extract_strided_slice %7 {offsets = [4, 0], sizes = [16, 16], strides = [1, 1]} : vector<20x16xf32> to vector<16x16xf32>
    %51 = vector.extract_strided_slice %8 {offsets = [4, 0], sizes = [16, 16], strides = [1, 1]} : vector<20x16xf32> to vector<16x16xf32>
    %c4 = arith.constant 4 : index
    %52 = memref.load %arg2[%c4] : memref<30xf32, #tpu.memory_space<smem>>
    %53 = vector.broadcast %52 : f32 to vector<16x16xf32>
    %54 = arith.mulf %53, %50 : vector<16x16xf32>
    %55 = arith.addf %49, %54 : vector<16x16xf32>
    %c9 = arith.constant 9 : index
    %56 = memref.load %arg2[%c9] : memref<30xf32, #tpu.memory_space<smem>>
    %57 = vector.broadcast %56 : f32 to vector<16x16xf32>
    %58 = arith.mulf %57, %51 : vector<16x16xf32>
    %59 = arith.addf %55, %58 : vector<16x16xf32>
    %c0_8 = arith.constant 0 : index
    %c0_9 = arith.constant 0 : index
    %c0_10 = arith.constant 0 : index
    %60 = vector.load %arg3[%c0_8, %c0_9, %c0_10] : memref<1x16x16xf32, #tpu.memory_space<vmem>>, vector<1x16x16xf32>
    %61 = vector.shape_cast %60 : vector<1x16x16xf32> to vector<16x16xf32>
    %62 = vector.shape_cast %59 : vector<16x16xf32> to vector<1x16x16xf32>
    tpu.vector_store %arg3[%c0_8, %c0_9, %c0_10], %62 {strides = array<i32>} : memref<1x16x16xf32, #tpu.memory_space<vmem>>, vector<1x16x16xf32>,
    %cst_11 = arith.constant dense<0xFF800000> : vector<4x16xf32>
    %63 = vector.multi_reduction <maximumf>, %1, %cst_11 [1] : vector<4x16x16xf32> to vector<4x16xf32>
    %64 = vector.shape_cast %63 : vector<4x16xf32> to vector<4x1x16xf32>
    %cst_12 = arith.constant dense<0.000000e+00> : vector<4x16xf32>
    %65 = vector.multi_reduction <add>, %1, %cst_12 [1] : vector<4x16x16xf32> to vector<4x16xf32>
    %66 = vector.shape_cast %65 : vector<4x16xf32> to vector<4x1x16xf32>
    %cst_13 = arith.constant 1.600000e+01 : f32
    %67 = vector.broadcast %cst_13 : f32 to vector<4x1x16xf32>
    %68 = arith.divf %66, %67 : vector<4x1x16xf32>
    %cst_14 = arith.constant 0.000000e+00 : f32
    %69 = vector.broadcast %cst_14 : f32 to vector<2x1x16xf32>
    %70 = tpu.concatenate %69, %64, %69 in 0 : vector<2x1x16xf32>, vector<4x1x16xf32>, vector<2x1x16xf32> -> vector<8x1x16xf32>
    %71 = tpu.concatenate %69, %68, %69 in 0 : vector<2x1x16xf32>, vector<4x1x16xf32>, vector<2x1x16xf32> -> vector<8x1x16xf32>
    %cst_15 = arith.constant 0.000000e+00 : f32
    %72 = vector.broadcast %cst_15 : f32 to vector<4x1x16xf32>
    %73 = vector.extract_strided_slice %70 {offsets = [0, 0, 0], sizes = [4, 1, 16], strides = [1, 1, 1]} : vector<8x1x16xf32> to vector<4x1x16xf32>
    %74 = vector.extract_strided_slice %71 {offsets = [0, 0, 0], sizes = [4, 1, 16], strides = [1, 1, 1]} : vector<8x1x16xf32> to vector<4x1x16xf32>
    %c10 = arith.constant 10 : index
    %75 = memref.load %arg2[%c10] : memref<30xf32, #tpu.memory_space<smem>>
    %76 = vector.broadcast %75 : f32 to vector<4x1x16xf32>
    %77 = arith.mulf %76, %73 : vector<4x1x16xf32>
    %78 = arith.addf %72, %77 : vector<4x1x16xf32>
    %c15 = arith.constant 15 : index
    %79 = memref.load %arg2[%c15] : memref<30xf32, #tpu.memory_space<smem>>
    %80 = vector.broadcast %79 : f32 to vector<4x1x16xf32>
    %81 = arith.mulf %80, %74 : vector<4x1x16xf32>
    %82 = arith.addf %78, %81 : vector<4x1x16xf32>
    %83 = vector.extract_strided_slice %70 {offsets = [1, 0, 0], sizes = [4, 1, 16], strides = [1, 1, 1]} : vector<8x1x16xf32> to vector<4x1x16xf32>
    %84 = vector.extract_strided_slice %71 {offsets = [1, 0, 0], sizes = [4, 1, 16], strides = [1, 1, 1]} : vector<8x1x16xf32> to vector<4x1x16xf32>
    %c11 = arith.constant 11 : index
    %85 = memref.load %arg2[%c11] : memref<30xf32, #tpu.memory_space<smem>>
    %86 = vector.broadcast %85 : f32 to vector<4x1x16xf32>
    %87 = arith.mulf %86, %83 : vector<4x1x16xf32>
    %88 = arith.addf %82, %87 : vector<4x1x16xf32>
    %c16 = arith.constant 16 : index
    %89 = memref.load %arg2[%c16] : memref<30xf32, #tpu.memory_space<smem>>
    %90 = vector.broadcast %89 : f32 to vector<4x1x16xf32>
    %91 = arith.mulf %90, %84 : vector<4x1x16xf32>
    %92 = arith.addf %88, %91 : vector<4x1x16xf32>
    %93 = vector.extract_strided_slice %70 {offsets = [2, 0, 0], sizes = [4, 1, 16], strides = [1, 1, 1]} : vector<8x1x16xf32> to vector<4x1x16xf32>
    %94 = vector.extract_strided_slice %71 {offsets = [2, 0, 0], sizes = [4, 1, 16], strides = [1, 1, 1]} : vector<8x1x16xf32> to vector<4x1x16xf32>
    %c12 = arith.constant 12 : index
    %95 = memref.load %arg2[%c12] : memref<30xf32, #tpu.memory_space<smem>>
    %96 = vector.broadcast %95 : f32 to vector<4x1x16xf32>
    %97 = arith.mulf %96, %93 : vector<4x1x16xf32>
    %98 = arith.addf %92, %97 : vector<4x1x16xf32>
    %c17 = arith.constant 17 : index
    %99 = memref.load %arg2[%c17] : memref<30xf32, #tpu.memory_space<smem>>
    %100 = vector.broadcast %99 : f32 to vector<4x1x16xf32>
    %101 = arith.mulf %100, %94 : vector<4x1x16xf32>
    %102 = arith.addf %98, %101 : vector<4x1x16xf32>
    %103 = vector.extract_strided_slice %70 {offsets = [3, 0, 0], sizes = [4, 1, 16], strides = [1, 1, 1]} : vector<8x1x16xf32> to vector<4x1x16xf32>
    %104 = vector.extract_strided_slice %71 {offsets = [3, 0, 0], sizes = [4, 1, 16], strides = [1, 1, 1]} : vector<8x1x16xf32> to vector<4x1x16xf32>
    %c13 = arith.constant 13 : index
    %105 = memref.load %arg2[%c13] : memref<30xf32, #tpu.memory_space<smem>>
    %106 = vector.broadcast %105 : f32 to vector<4x1x16xf32>
    %107 = arith.mulf %106, %103 : vector<4x1x16xf32>
    %108 = arith.addf %102, %107 : vector<4x1x16xf32>
    %c18 = arith.constant 18 : index
    %109 = memref.load %arg2[%c18] : memref<30xf32, #tpu.memory_space<smem>>
    %110 = vector.broadcast %109 : f32 to vector<4x1x16xf32>
    %111 = arith.mulf %110, %104 : vector<4x1x16xf32>
    %112 = arith.addf %108, %111 : vector<4x1x16xf32>
    %113 = vector.extract_strided_slice %70 {offsets = [4, 0, 0], sizes = [4, 1, 16], strides = [1, 1, 1]} : vector<8x1x16xf32> to vector<4x1x16xf32>
    %114 = vector.extract_strided_slice %71 {offsets = [4, 0, 0], sizes = [4, 1, 16], strides = [1, 1, 1]} : vector<8x1x16xf32> to vector<4x1x16xf32>
    %c14 = arith.constant 14 : index
    %115 = memref.load %arg2[%c14] : memref<30xf32, #tpu.memory_space<smem>>
    %116 = vector.broadcast %115 : f32 to vector<4x1x16xf32>
    %117 = arith.mulf %116, %113 : vector<4x1x16xf32>
    %118 = arith.addf %112, %117 : vector<4x1x16xf32>
    %c19 = arith.constant 19 : index
    %119 = memref.load %arg2[%c19] : memref<30xf32, #tpu.memory_space<smem>>
    %120 = vector.broadcast %119 : f32 to vector<4x1x16xf32>
    %121 = arith.mulf %120, %114 : vector<4x1x16xf32>
    %122 = arith.addf %118, %121 : vector<4x1x16xf32>
    %c0_16 = arith.constant 0 : index
    %c0_17 = arith.constant 0 : index
    %c0_18 = arith.constant 0 : index
    %c0_19 = arith.constant 0 : index
    %123 = vector.load %arg4[%c0_16, %c0_17, %c0_18, %c0_19] : memref<1x4x1x16xf32, #tpu.memory_space<vmem>>, vector<1x4x1x16xf32>
    %124 = vector.shape_cast %123 : vector<1x4x1x16xf32> to vector<4x1x16xf32>
    %125 = vector.shape_cast %122 : vector<4x1x16xf32> to vector<1x4x1x16xf32>
    tpu.vector_store %arg4[%c0_16, %c0_17, %c0_18, %c0_19], %125 {strides = array<i32>} : memref<1x4x1x16xf32, #tpu.memory_space<vmem>>, vector<1x4x1x16xf32>,
    %cst_20 = arith.constant dense<0xFF800000> : vector<4x16xf32>
    %126 = vector.multi_reduction <maximumf>, %1, %cst_20 [2] : vector<4x16x16xf32> to vector<4x16xf32>
    %127 = vector.shape_cast %126 : vector<4x16xf32> to vector<4x16x1xf32>
    %cst_21 = arith.constant dense<0.000000e+00> : vector<4x16xf32>
    %128 = vector.multi_reduction <add>, %1, %cst_21 [2] : vector<4x16x16xf32> to vector<4x16xf32>
    %129 = vector.shape_cast %128 : vector<4x16xf32> to vector<4x16x1xf32>
    %cst_22 = arith.constant 1.600000e+01 : f32
    %130 = vector.broadcast %cst_22 : f32 to vector<4x16x1xf32>
    %131 = arith.divf %129, %130 : vector<4x16x1xf32>
    %cst_23 = arith.constant 0.000000e+00 : f32
    %132 = vector.broadcast %cst_23 : f32 to vector<4x2x1xf32>
    %133 = tpu.concatenate %132, %127, %132 in 1 : vector<4x2x1xf32>, vector<4x16x1xf32>, vector<4x2x1xf32> -> vector<4x20x1xf32>
    %134 = tpu.concatenate %132, %131, %132 in 1 : vector<4x2x1xf32>, vector<4x16x1xf32>, vector<4x2x1xf32> -> vector<4x20x1xf32>
    %cst_24 = arith.constant 0.000000e+00 : f32
    %135 = vector.broadcast %cst_24 : f32 to vector<4x16x1xf32>
    %136 = vector.extract_strided_slice %133 {offsets = [0, 0, 0], sizes = [4, 16, 1], strides = [1, 1, 1]} : vector<4x20x1xf32> to vector<4x16x1xf32>
    %137 = vector.extract_strided_slice %134 {offsets = [0, 0, 0], sizes = [4, 16, 1], strides = [1, 1, 1]} : vector<4x20x1xf32> to vector<4x16x1xf32>
    %c20 = arith.constant 20 : index
    %138 = memref.load %arg2[%c20] : memref<30xf32, #tpu.memory_space<smem>>
    %139 = vector.broadcast %138 : f32 to vector<4x16x1xf32>
    %140 = arith.mulf %139, %136 : vector<4x16x1xf32>
    %141 = arith.addf %135, %140 : vector<4x16x1xf32>
    %c25 = arith.constant 25 : index
    %142 = memref.load %arg2[%c25] : memref<30xf32, #tpu.memory_space<smem>>
    %143 = vector.broadcast %142 : f32 to vector<4x16x1xf32>
    %144 = arith.mulf %143, %137 : vector<4x16x1xf32>
    %145 = arith.addf %141, %144 : vector<4x16x1xf32>
    %146 = vector.extract_strided_slice %133 {offsets = [0, 1, 0], sizes = [4, 16, 1], strides = [1, 1, 1]} : vector<4x20x1xf32> to vector<4x16x1xf32>
    %147 = vector.extract_strided_slice %134 {offsets = [0, 1, 0], sizes = [4, 16, 1], strides = [1, 1, 1]} : vector<4x20x1xf32> to vector<4x16x1xf32>
    %c21 = arith.constant 21 : index
    %148 = memref.load %arg2[%c21] : memref<30xf32, #tpu.memory_space<smem>>
    %149 = vector.broadcast %148 : f32 to vector<4x16x1xf32>
    %150 = arith.mulf %149, %146 : vector<4x16x1xf32>
    %151 = arith.addf %145, %150 : vector<4x16x1xf32>
    %c26 = arith.constant 26 : index
    %152 = memref.load %arg2[%c26] : memref<30xf32, #tpu.memory_space<smem>>
    %153 = vector.broadcast %152 : f32 to vector<4x16x1xf32>
    %154 = arith.mulf %153, %147 : vector<4x16x1xf32>
    %155 = arith.addf %151, %154 : vector<4x16x1xf32>
    %156 = vector.extract_strided_slice %133 {offsets = [0, 2, 0], sizes = [4, 16, 1], strides = [1, 1, 1]} : vector<4x20x1xf32> to vector<4x16x1xf32>
    %157 = vector.extract_strided_slice %134 {offsets = [0, 2, 0], sizes = [4, 16, 1], strides = [1, 1, 1]} : vector<4x20x1xf32> to vector<4x16x1xf32>
    %c22 = arith.constant 22 : index
    %158 = memref.load %arg2[%c22] : memref<30xf32, #tpu.memory_space<smem>>
    %159 = vector.broadcast %158 : f32 to vector<4x16x1xf32>
    %160 = arith.mulf %159, %156 : vector<4x16x1xf32>
    %161 = arith.addf %155, %160 : vector<4x16x1xf32>
    %c27 = arith.constant 27 : index
    %162 = memref.load %arg2[%c27] : memref<30xf32, #tpu.memory_space<smem>>
    %163 = vector.broadcast %162 : f32 to vector<4x16x1xf32>
    %164 = arith.mulf %163, %157 : vector<4x16x1xf32>
    %165 = arith.addf %161, %164 : vector<4x16x1xf32>
    %166 = vector.extract_strided_slice %133 {offsets = [0, 3, 0], sizes = [4, 16, 1], strides = [1, 1, 1]} : vector<4x20x1xf32> to vector<4x16x1xf32>
    %167 = vector.extract_strided_slice %134 {offsets = [0, 3, 0], sizes = [4, 16, 1], strides = [1, 1, 1]} : vector<4x20x1xf32> to vector<4x16x1xf32>
    %c23 = arith.constant 23 : index
    %168 = memref.load %arg2[%c23] : memref<30xf32, #tpu.memory_space<smem>>
    %169 = vector.broadcast %168 : f32 to vector<4x16x1xf32>
    %170 = arith.mulf %169, %166 : vector<4x16x1xf32>
    %171 = arith.addf %165, %170 : vector<4x16x1xf32>
    %c28 = arith.constant 28 : index
    %172 = memref.load %arg2[%c28] : memref<30xf32, #tpu.memory_space<smem>>
    %173 = vector.broadcast %172 : f32 to vector<4x16x1xf32>
    %174 = arith.mulf %173, %167 : vector<4x16x1xf32>
    %175 = arith.addf %171, %174 : vector<4x16x1xf32>
    %176 = vector.extract_strided_slice %133 {offsets = [0, 4, 0], sizes = [4, 16, 1], strides = [1, 1, 1]} : vector<4x20x1xf32> to vector<4x16x1xf32>
    %177 = vector.extract_strided_slice %134 {offsets = [0, 4, 0], sizes = [4, 16, 1], strides = [1, 1, 1]} : vector<4x20x1xf32> to vector<4x16x1xf32>
    %c24 = arith.constant 24 : index
    %178 = memref.load %arg2[%c24] : memref<30xf32, #tpu.memory_space<smem>>
    %179 = vector.broadcast %178 : f32 to vector<4x16x1xf32>
    %180 = arith.mulf %179, %176 : vector<4x16x1xf32>
    %181 = arith.addf %175, %180 : vector<4x16x1xf32>
    %c29 = arith.constant 29 : index
    %182 = memref.load %arg2[%c29] : memref<30xf32, #tpu.memory_space<smem>>
    %183 = vector.broadcast %182 : f32 to vector<4x16x1xf32>
    %184 = arith.mulf %183, %177 : vector<4x16x1xf32>
    %185 = arith.addf %181, %184 : vector<4x16x1xf32>
    %c0_25 = arith.constant 0 : index
    %c0_26 = arith.constant 0 : index
    %c0_27 = arith.constant 0 : index
    %c0_28 = arith.constant 0 : index
    %186 = vector.load %arg5[%c0_25, %c0_26, %c0_27, %c0_28] : memref<1x4x16x1xf32, #tpu.memory_space<vmem>>, vector<1x4x16x1xf32>
    %187 = vector.shape_cast %186 : vector<1x4x16x1xf32> to vector<4x16x1xf32>
    %188 = vector.shape_cast %185 : vector<4x16x1xf32> to vector<1x4x16x1xf32>
    tpu.vector_store %arg5[%c0_25, %c0_26, %c0_27, %c0_28], %188 {strides = array<i32>} : memref<1x4x16x1xf32, #tpu.memory_space<vmem>>, vector<1x4x16x1xf32>,
    return
  }
  func.func @transform_0(%arg0: i32) -> (i32, i32, i32, i32) {
    %c0_i32 = arith.constant 0 : i32
    %c0_i32_0 = arith.constant 0 : i32
    %c0_i32_1 = arith.constant 0 : i32
    %c0_i32_2 = arith.constant 0 : i32
    return %arg0, %c0_i32, %c0_i32_0, %c0_i32_1 : i32, i32, i32, i32
  }
  func.func @transform_1(%arg0: i32) -> i32 {
    %c0_i32 = arith.constant 0 : i32
    %c0_i32_0 = arith.constant 0 : i32
    return %c0_i32 : i32
  }
  func.func @transform_2(%arg0: i32) -> (i32, i32, i32) {
    %c0_i32 = arith.constant 0 : i32
    %c0_i32_0 = arith.constant 0 : i32
    %c0_i32_1 = arith.constant 0 : i32
    return %arg0, %c0_i32, %c0_i32_0 : i32, i32, i32
  }
  func.func @transform_3(%arg0: i32) -> (i32, i32, i32, i32) {
    %c0_i32 = arith.constant 0 : i32
    %c0_i32_0 = arith.constant 0 : i32
    %c0_i32_1 = arith.constant 0 : i32
    %c0_i32_2 = arith.constant 0 : i32
    return %arg0, %c0_i32, %c0_i32_0, %c0_i32_1 : i32, i32, i32, i32
  }
  func.func @transform_4(%arg0: i32) -> (i32, i32, i32, i32) {
    %c0_i32 = arith.constant 0 : i32
    %c0_i32_0 = arith.constant 0 : i32
    %c0_i32_1 = arith.constant 0 : i32
    %c0_i32_2 = arith.constant 0 : i32
    return %arg0, %c0_i32, %c0_i32_0, %c0_i32_1 : i32, i32, i32, i32
  }
}

module attributes {stable_mosaic.version = 11 : i64} {
  func.func @_combine_kernel(%arg0: i32, %arg1: i32, %arg2: memref<9xf32, #tpu.memory_space<smem>>, %arg3: memref<1x4x16x16xf32, #tpu.memory_space<vmem>>, %arg4: memref<1x16x16xf32, #tpu.memory_space<vmem>>, %arg5: memref<1x4x1x16xf32, #tpu.memory_space<vmem>>, %arg6: memref<1x4x16x1xf32, #tpu.memory_space<vmem>>, %arg7: memref<1x4x16x16xf32, #tpu.memory_space<vmem>>) attributes {dimension_semantics = [#tpu.dimension_semantics<parallel>, #tpu.dimension_semantics<parallel>], iteration_bounds = array<i64: 2, 1>, scalar_prefetch = 0 : i64, scratch_operands = 0 : i64, tpu.core_type = #tpu.core_type<tc>, window_params = [{transform_indices = @transform_0, window_bounds = array<i64: 9>}, {transform_indices = @transform_1, window_bounds = array<i64: 1, 4, 16, 16>}, {transform_indices = @transform_2, window_bounds = array<i64: 1, 16, 16>}, {transform_indices = @transform_3, window_bounds = array<i64: 1, 4, 1, 16>}, {transform_indices = @transform_4, window_bounds = array<i64: 1, 4, 16, 1>}, {transform_indices = @transform_5, window_bounds = array<i64: 1, 4, 16, 16>}]} {
    %c0 = arith.constant 0 : index
    %c0_0 = arith.constant 0 : index
    %c0_1 = arith.constant 0 : index
    %0 = vector.load %arg4[%c0, %c0_0, %c0_1] : memref<1x16x16xf32, #tpu.memory_space<vmem>>, vector<1x16x16xf32>
    %c0_2 = arith.constant 0 : index
    %1 = memref.load %arg2[%c0_2] : memref<9xf32, #tpu.memory_space<smem>>
    %c1 = arith.constant 1 : index
    %2 = memref.load %arg2[%c1] : memref<9xf32, #tpu.memory_space<smem>>
    %3 = vector.broadcast %1 : f32 to vector<1x16x16xf32>
    %4 = arith.mulf %0, %3 : vector<1x16x16xf32>
    %5 = vector.broadcast %2 : f32 to vector<1x16x16xf32>
    %6 = arith.addf %4, %5 : vector<1x16x16xf32>
    %cst = arith.constant 0.000000e+00 : f32
    %7 = vector.broadcast %cst : f32 to vector<1x16x16xf32>
    %8 = arith.subf %7, %6 : vector<1x16x16xf32>
    %9 = math.exp %8 : vector<1x16x16xf32>
    %cst_3 = arith.constant 1.000000e+00 : f32
    %10 = vector.broadcast %cst_3 : f32 to vector<1x16x16xf32>
    %11 = arith.addf %10, %9 : vector<1x16x16xf32>
    %cst_4 = arith.constant 1.000000e+00 : f32
    %12 = vector.broadcast %cst_4 : f32 to vector<1x16x16xf32>
    %13 = arith.divf %12, %11 : vector<1x16x16xf32>
    %14 = vector.shape_cast %13 : vector<1x16x16xf32> to vector<1x1x16x16xf32>
    %c0_5 = arith.constant 0 : index
    %c0_6 = arith.constant 0 : index
    %c0_7 = arith.constant 0 : index
    %c0_8 = arith.constant 0 : index
    %15 = vector.load %arg5[%c0_5, %c0_6, %c0_7, %c0_8] : memref<1x4x1x16xf32, #tpu.memory_space<vmem>>, vector<1x4x1x16xf32>
    %c2 = arith.constant 2 : index
    %16 = memref.load %arg2[%c2] : memref<9xf32, #tpu.memory_space<smem>>
    %c3 = arith.constant 3 : index
    %17 = memref.load %arg2[%c3] : memref<9xf32, #tpu.memory_space<smem>>
    %18 = vector.broadcast %16 : f32 to vector<1x4x1x16xf32>
    %19 = arith.mulf %15, %18 : vector<1x4x1x16xf32>
    %20 = vector.broadcast %17 : f32 to vector<1x4x1x16xf32>
    %21 = arith.addf %19, %20 : vector<1x4x1x16xf32>
    %cst_9 = arith.constant 0.000000e+00 : f32
    %22 = vector.broadcast %cst_9 : f32 to vector<1x4x1x16xf32>
    %23 = arith.subf %22, %21 : vector<1x4x1x16xf32>
    %24 = math.exp %23 : vector<1x4x1x16xf32>
    %cst_10 = arith.constant 1.000000e+00 : f32
    %25 = vector.broadcast %cst_10 : f32 to vector<1x4x1x16xf32>
    %26 = arith.addf %25, %24 : vector<1x4x1x16xf32>
    %cst_11 = arith.constant 1.000000e+00 : f32
    %27 = vector.broadcast %cst_11 : f32 to vector<1x4x1x16xf32>
    %28 = arith.divf %27, %26 : vector<1x4x1x16xf32>
    %c0_12 = arith.constant 0 : index
    %c0_13 = arith.constant 0 : index
    %c0_14 = arith.constant 0 : index
    %c0_15 = arith.constant 0 : index
    %29 = vector.load %arg6[%c0_12, %c0_13, %c0_14, %c0_15] : memref<1x4x16x1xf32, #tpu.memory_space<vmem>>, vector<1x4x16x1xf32>
    %c4 = arith.constant 4 : index
    %30 = memref.load %arg2[%c4] : memref<9xf32, #tpu.memory_space<smem>>
    %c5 = arith.constant 5 : index
    %31 = memref.load %arg2[%c5] : memref<9xf32, #tpu.memory_space<smem>>
    %32 = vector.broadcast %30 : f32 to vector<1x4x16x1xf32>
    %33 = arith.mulf %29, %32 : vector<1x4x16x1xf32>
    %34 = vector.broadcast %31 : f32 to vector<1x4x16x1xf32>
    %35 = arith.addf %33, %34 : vector<1x4x16x1xf32>
    %cst_16 = arith.constant 0.000000e+00 : f32
    %36 = vector.broadcast %cst_16 : f32 to vector<1x4x16x1xf32>
    %37 = arith.subf %36, %35 : vector<1x4x16x1xf32>
    %38 = math.exp %37 : vector<1x4x16x1xf32>
    %cst_17 = arith.constant 1.000000e+00 : f32
    %39 = vector.broadcast %cst_17 : f32 to vector<1x4x16x1xf32>
    %40 = arith.addf %39, %38 : vector<1x4x16x1xf32>
    %cst_18 = arith.constant 1.000000e+00 : f32
    %41 = vector.broadcast %cst_18 : f32 to vector<1x4x16x1xf32>
    %42 = arith.divf %41, %40 : vector<1x4x16x1xf32>
    %c6 = arith.constant 6 : index
    %43 = memref.load %arg2[%c6] : memref<9xf32, #tpu.memory_space<smem>>
    %44 = vector.broadcast %43 : f32 to vector<1x1x16x16xf32>
    %45 = arith.mulf %44, %14 : vector<1x1x16x16xf32>
    %c7 = arith.constant 7 : index
    %46 = memref.load %arg2[%c7] : memref<9xf32, #tpu.memory_space<smem>>
    %47 = vector.broadcast %46 : f32 to vector<1x4x1x16xf32>
    %48 = arith.mulf %47, %28 : vector<1x4x1x16xf32>
    %49 = vector.broadcast %45 : vector<1x1x16x16xf32> to vector<1x4x16x16xf32>
    %50 = vector.broadcast %48 : vector<1x4x1x16xf32> to vector<1x4x16x16xf32>
    %51 = arith.addf %49, %50 : vector<1x4x16x16xf32>
    %c8 = arith.constant 8 : index
    %52 = memref.load %arg2[%c8] : memref<9xf32, #tpu.memory_space<smem>>
    %53 = vector.broadcast %52 : f32 to vector<1x4x16x1xf32>
    %54 = arith.mulf %53, %42 : vector<1x4x16x1xf32>
    %55 = vector.broadcast %54 : vector<1x4x16x1xf32> to vector<1x4x16x16xf32>
    %56 = arith.addf %51, %55 : vector<1x4x16x16xf32>
    %c0_19 = arith.constant 0 : index
    %c0_20 = arith.constant 0 : index
    %c0_21 = arith.constant 0 : index
    %c0_22 = arith.constant 0 : index
    %57 = vector.load %arg3[%c0_19, %c0_20, %c0_21, %c0_22] : memref<1x4x16x16xf32, #tpu.memory_space<vmem>>, vector<1x4x16x16xf32>
    %58 = arith.mulf %57, %56 : vector<1x4x16x16xf32>
    %c0_23 = arith.constant 0 : index
    %c0_24 = arith.constant 0 : index
    %c0_25 = arith.constant 0 : index
    %c0_26 = arith.constant 0 : index
    %59 = vector.load %arg7[%c0_23, %c0_24, %c0_25, %c0_26] : memref<1x4x16x16xf32, #tpu.memory_space<vmem>>, vector<1x4x16x16xf32>
    tpu.vector_store %arg7[%c0_23, %c0_24, %c0_25, %c0_26], %58 {strides = array<i32>} : memref<1x4x16x16xf32, #tpu.memory_space<vmem>>, vector<1x4x16x16xf32>,
    return
  }
  func.func @transform_0(%arg0: i32, %arg1: i32) -> i32 {
    %c0_i32 = arith.constant 0 : i32
    %c0_i32_0 = arith.constant 0 : i32
    return %c0_i32 : i32
  }
  func.func @transform_1(%arg0: i32, %arg1: i32) -> (i32, i32, i32, i32) {
    %c0_i32 = arith.constant 0 : i32
    %c0_i32_0 = arith.constant 0 : i32
    %c0_i32_1 = arith.constant 0 : i32
    return %arg0, %arg1, %c0_i32, %c0_i32_0 : i32, i32, i32, i32
  }
  func.func @transform_2(%arg0: i32, %arg1: i32) -> (i32, i32, i32) {
    %c0_i32 = arith.constant 0 : i32
    %c0_i32_0 = arith.constant 0 : i32
    %c0_i32_1 = arith.constant 0 : i32
    return %arg0, %c0_i32, %c0_i32_0 : i32, i32, i32
  }
  func.func @transform_3(%arg0: i32, %arg1: i32) -> (i32, i32, i32, i32) {
    %c0_i32 = arith.constant 0 : i32
    %c0_i32_0 = arith.constant 0 : i32
    %c0_i32_1 = arith.constant 0 : i32
    return %arg0, %arg1, %c0_i32, %c0_i32_0 : i32, i32, i32, i32
  }
  func.func @transform_4(%arg0: i32, %arg1: i32) -> (i32, i32, i32, i32) {
    %c0_i32 = arith.constant 0 : i32
    %c0_i32_0 = arith.constant 0 : i32
    %c0_i32_1 = arith.constant 0 : i32
    return %arg0, %arg1, %c0_i32, %c0_i32_0 : i32, i32, i32, i32
  }
  func.func @transform_5(%arg0: i32, %arg1: i32) -> (i32, i32, i32, i32) {
    %c0_i32 = arith.constant 0 : i32
    %c0_i32_0 = arith.constant 0 : i32
    %c0_i32_1 = arith.constant 0 : i32
    return %arg0, %arg1, %c0_i32, %c0_i32_0 : i32, i32, i32, i32
  }
}

</mosaic_0001>

<bundles_post_ra>
// kernel: triplet_attention_forward.3
= control target key start
LH: loop header
LB: loop body
LE: loop exit
PB: predicated region body
PF: predicated region fallthrough
CT: control target
= control target key end

     0   :  { %10 = vsyncpa [#allocation4], 0  ;;  %s1265_s0 = inlined_call_operand.vmem [shape: f32[9], index: 0, kind: input, shape index: {}]   ;;  %s1266_s1 = inlined_call_operand.vmem [shape: f32[2,4,16,16], index: 1, kind: input, shape index: {}]   ;;  %s1267_s2 = inlined_call_operand.vmem [shape: f32[2,16,16], index: 2, kind: input, shape index: {}]   ;;  %s1268_s3 = inlined_call_operand.vmem [shape: f32[2,4,1,16], index: 3, kind: input, shape index: {}]   ;;  %s1269_s4 = inlined_call_operand.vmem [shape: f32[2,4,16,1], index: 4, kind: input, shape index: {}]   ;;  %s1270_s5 = inlined_call_operand.hbm [shape: f32[2,4,16,16], index: 5, kind: output, shape index: {}]  }
   0x1   :  { %11 = vsyncpa [#allocation3], 0 }
   0x2   :  { %13 = vsyncpa [#allocation3 + $0x1], 0  ;;  %s1078_s18 = smov 0   ;;  %s1080_s19 = smov 0  }
   0x3   :  { %s1082_s20 = smov 0   ;;  %s1084_s21 = smov 0  }
   0x4   :  { %s1086_s22 = smov 0   ;;  %s1088_s23 = smov 0  }
   0x5 LB: > { %s785_s24 = sadd.s32 4294967295, %s1041_s23   ;;  %s786_s25 = sadd.s32 4294967294, %s1041_s23   ;;  %s1041_s23 = sphi %s1088_s23, %s19_s23   ;;  %s1037_s22 = sphi %s1086_s22, %s1279_s22   ;;  %s1033_s21 = sphi %s1084_s21, %s1278_s21   ;;  %s1029_s20 = sphi %s1082_s20, %s1277_s20   ;;  %s1025_s19 = sphi %s1080_s19, %s1276_s19   ;;  %s1021_s18 = sphi %s1078_s18, %s1275_s18  }
   0x6   : > { %s31_s26 = sadd.s32 1, %s1037_s22  ;;  %s171_s27 = sadd.s32 1, %s1029_s20 }
   0x7   : > { %p33_p0 = scmp.ge.s32.totalorder %s31_s26, 2  ;;  %p181_p1 = scmp.ne.s32.totalorder %s1029_s20, %s1025_s19 }
   0x8   : > { %p182_p2 = scmp.eq.s32.totalorder %s785_s24, 1  ;;  %p187_p3 = scmp.ne.s32.totalorder %s1025_s19, %s1021_s18 }
   0x9   : > { %s1281_s26 = smov (%p33_p0, %s31_s26), 0  ;;  %p188_p5 = scmp.eq.s32.totalorder %s786_s25, 1 }
   0xa   : > { %p1118_p4 = por %p182_p2, %p181_p1  ;;  %s166_s29 = ssub.s32 %s1037_s22, %s1281_s26 }
   0xb   : > { %p787_p6 = scmp.ge.s32.totalorder %s1041_s23, 1  ;;  %p169_p7 = scmp.eq.s32.totalorder %s166_s29, 0 }
   0xc   : > { %p1125_p8 = por %p188_p5, %p187_p3  ;;  %p195_p9 = scmp.lt.s32.totalorder %s1041_s23, 3 }
   0xd   : > { %s1131_s6 = scalar_select %p169_p7, %s1029_s20, %s171_s27  }
   0xe   : > { %p1133_p10 = pnand %p787_p6, %p195_p9  ;;  %p1137_p11 = scmp.eq.s32.totalorder %s785_s24, 0 }
   0xf   : > { %s208_s11 = sshll.u32 %s1265_s0, 4  ;;  %s209_s11 = int_to_ptr.vmem [resolvable:$true] %s208_s11 }
  0x10   : > { %p823_p12 = pneg %p1133_p10  ;;  %s944_s12 = scalar_lea.vmem %s209_s11, 16 }
  0x11   : > { %p945_p0 = scmp.ne.s32.totalorder %s209_s11, %s944_s12  ;;  %p952_p5 = scmp.lt.s32.totalorder %s209_s11, %s209_s11 }
  0x12   : > { %p824_p13 = pnand %p1137_p11, %p823_p12  ;;  %p953_p6 = scmp.lt.s32.totalorder %s944_s12, %s944_s12 }
  0x14   : > { %p946_p1 = pneg %p824_p13  ;;  %p954_p7 = por %p953_p6, %p952_p5 }
  0x16   : > { %p947_p2 = pnand %p946_p1, %p945_p0 }
  0x18   : > { %p948_p3 = pneg %p947_p2 }
  0x1a   : > { %p955_p9 = pnand %p954_p7, %p948_p3 }
  0x1c   : > { %958 = shalt.err (!%p955_p9)
}
  0x1d   : > { %s1043_s13 = smov [#allocation2]   ;;  %269 = sbr.rel (%p1133_p10) target bundleno = 240 (0xf0), region = 40 }
  0x1e   : > { %826 = dma.vmem_to_smem (!%p824_p13), %s209_s11, 16, %s1043_s13, [#allocation4]  }
  0x24   : > { %1012 = dma.done.wait (%p1137_p11), [#allocation4], 16  }
  0x25   : > { %1014 = vsyncadd (%p1137_p11), [#allocation4], 4294967280 }
  0x26   : > { %275 = sfence }
  0x27   : > { %p327_p12 = scmp.lt.s32.totalorder %s1033_s21, 1  ;;  %s803_s14 = sld [smem:[#allocation2 + $0x4]]  ;;  %v1044_v0 = vmov 0   ;;  %vm617_vm0 = vcmask 130048  }
  0x28   : > { %887 = vset.pattern.permute.xlu1 %v1044_v0  ;;  %886 = vset.pattern.permute.xlu0 %v1044_v0  ;;  %s804_s15 = sld [smem:[#allocation2 + $0x5]]  ;;  %s807_s29 = sld [smem:[#allocation2 + $0x8]] }
  0x29   : > { %s1156_s16 = scalar_select %p327_p12, %s1033_s21, 1 }
  0x2a   : > { %s801_s7 = sld [smem:[#allocation2 + $0x2]]  ;;  %s365_s9 = sld [smem:[#allocation2]] }
  0x2b   : > { %s813_s17 = sshll.u32 %s1156_s16, 6  ;;  %s797_s8 = sshll.u32 %s1156_s16, 2 }
  0x2c   : > { %s360_s27 = scalar_lea.vmem %s1269_s4, %s813_s17  ;;  %s802_s10 = sld [smem:[#allocation2 + $0x3]] }
  0x2d   : > { %v427_v1 = vld [vmem:[%s360_s27 + $0x10] sm:$0xff]  ;;  %v435_v2 = vstv %s803_s14  ;;  %v425_v3 = vld [vmem:[%s360_s27] sm:$0xff]  ;;  %v428_v4 = vld [vmem:[%s360_s27 + $0x18] sm:$0xff]  ;;  %s349_s13 = scalar_lea.vmem %s1268_s3, %s797_s8  ;;  %s814_s14 = sshll.u32 %s1156_s16, 4 }
  0x2e   : > { %v438_v5 = vmul.f32 %v435_v2, %v427_v1  ;;  %v444_v6 = vstv %s804_s15  ;;  %v436_v7 = vmul.f32 %v435_v2, %v425_v3  ;;  %v426_v8 = vld [vmem:[%s360_s27 + $0x8] sm:$0xff]  ;;  %v439_v10 = vmul.f32 %v435_v2, %v428_v4  ;;  %v429_v13 = vld [vmem:[%s360_s27 + $0x20] sm:$0xff]  ;;  %v432_v14 = vld [vmem:[%s360_s27 + $0x38] sm:$0xff]  ;;  %s800_s15 = sld [smem:[#allocation2 + $0x1]]  ;;  %s323_s8 = sand.u32 1, %s1025_s19  }
  0x2f   : > { %v430_v9 = vld [vmem:[%s360_s27 + $0x28] sm:$0xff]  ;;  %v437_v11 = vmul.f32 %v435_v2, %v426_v8  ;;  %v431_v15 = vld [vmem:[%s360_s27 + $0x30] sm:$0xff]  ;;  %v440_v18 = vmul.f32 %v435_v2, %v429_v13  ;;  %v443_v19 = vmul.f32 %v435_v2, %v432_v14  ;;  %v544_v59 = vstv %s807_s29  ;;  %s341_s27 = scalar_lea.vmem %s1267_s2, %s814_s14  ;;  %v385_v14 = vld [vmem:[%s349_s13] sm:$0x1]  ;;  %s806_s29 = sld [smem:[#allocation2 + $0x7]] }
  0x30   : > { %v441_v12 = vmul.f32 %v435_v2, %v430_v9  ;;  %v447_v16 = vadd.f32 %v444_v6, %v438_v5  ;;  %v445_v17 = vadd.f32 %v444_v6, %v436_v7  ;;  %v448_v20 = vadd.f32 %v444_v6, %v439_v10  ;;  %s1178_s11 = scalar_lea.vmem %s1266_s1, %s813_s17  ;;  %s792_s12 = sshll.u32 %s323_s8, 6 }
  0x31   : > { %v446_v21 = vadd.f32 %v444_v6, %v437_v11  ;;  %v442_v23 = vmul.f32 %v435_v2, %v431_v15  ;;  %v449_v26 = vadd.f32 %v444_v6, %v440_v18  ;;  %v452_v27 = vadd.f32 %v444_v6, %v443_v19  ;;  %s1185_s16 = scalar_lea.vmem [#allocation5], %s792_s12  ;;  %s816_s17 = sshll.u32 %s1033_s21, 10 }
  0x32   : > { %v450_v22 = vadd.f32 %v444_v6, %v441_v12  ;;  %v455_v24 = vsub.f32 0.0, %v447_v16  ;;  %v453_v25 = vsub.f32 0.0, %v445_v17  ;;  %v456_v28 = vsub.f32 0.0, %v448_v20  ;;  %v386_v12 = vld [vmem:[%s349_s13 + $0x1] sm:$0x1]  ;;  %s1209_s24 = scalar_lea.hbm %s1270_s5, %s816_s17  ;;  %s1219_s21 = scalar_lea.sflag [#allocation3], %s323_s8 }
  0x33   : > { %v454_v29 = vsub.f32 0.0, %v446_v21  ;;  %v451_v31 = vadd.f32 %v444_v6, %v442_v23  ;;  %v457_v34 = vsub.f32 0.0, %v449_v26  ;;  %v460_v35 = vsub.f32 0.0, %v452_v27  ;;  %v363_v16 = vld [vmem:[%s341_s27] sm:$0xff] }
  0x34   : > { %v458_v30 = vsub.f32 0.0, %v450_v22  ;;  %v465_v32 = vmul.f32 1.442695, %v455_v24  ;;  %v461_v33 = vmul.f32 1.442695, %v453_v25  ;;  %v391_v13 = vstv %s801_s7  ;;  %v364_v22 = vld [vmem:[%s341_s27 + $0x8] sm:$0xff] }
  0x35   : > { %v467_v36 = vmul.f32 1.442695, %v456_v28  ;;  %v463_v37 = vmul.f32 1.442695, %v454_v29  ;;  %v459_v39 = vsub.f32 0.0, %v451_v31  ;;  %v393_v15 = vmul.f32 %v391_v13, %v386_v12  ;;  %s805_s7 = sld [smem:[#allocation2 + $0x6]] }
  0x36   : > { %888 = vpow2.f32 %v465_v32  ;;  %v471_v38 = vmul.f32 1.442695, %v458_v30  ;;  %v469_v40 = vmul.f32 1.442695, %v457_v34  ;;  %v475_v41 = vmul.f32 1.442695, %v460_v35 }
  0x37   : > { %890 = vpow2.f32 %v461_v33  ;;  %v473_v42 = vmul.f32 1.442695, %v459_v39  ;;  %v367_v17 = vstv %s365_s9  ;;  %v396_v18 = vstv %s802_s10  ;;  %v387_v25 = vld [vmem:[%s349_s13 + $0x2] sm:$0x1]  ;;  %v388_v31 = vld [vmem:[%s349_s13 + $0x3] sm:$0x1] }
  0x38   : > { %892 = vpow2.f32 %v467_v36  ;;  %v392_v19 = vmul.f32 %v391_v13, %v385_v14  ;;  %v368_v20 = vmul.f32 %v367_v17, %v363_v16  ;;  %v398_v21 = vadd.f32 %v396_v18, %v393_v15  ;;  %v603_v15 = vld [vmem:[%s1178_s11 + $0x10] sm:$0xff]  ;;  %s643_s13 = sshll.u32 %s1185_s16, 4  ;;  %s1045_s27 = smov [#allocation5]   ;;  %s1211_s13 = int_to_ptr.vmem [resolvable:$true] %s643_s13 }
  0x39   : > { %894 = vpow2.f32 %v463_v37  ;;  %v370_v23 = vstv %s800_s15  ;;  %v369_v26 = vmul.f32 %v367_v17, %v364_v22  ;;  %v394_v29 = vmul.f32 %v391_v13, %v387_v25  ;;  %s959_s25 = scalar_lea.vmem %s1211_s13, 1024 }
  0x3a   : > { %896 = vpow2.f32 %v471_v38  ;;  %v397_v24 = vadd.f32 %v396_v18, %v392_v19  ;;  %v371_v27 = vadd.f32 %v370_v23, %v368_v20  ;;  %v402_v28 = vsub.f32 0.0, %v398_v21  ;;  %p960_p10 = scmp.ne.s32.totalorder %s1211_s13, %s959_s25 }
  0x3b   : > { %898 = vpow2.f32 %v469_v40  ;;  %v372_v32 = vadd.f32 %v370_v23, %v369_v26  ;;  %v399_v35 = vadd.f32 %v396_v18, %v394_v29  ;;  %v395_v36 = vmul.f32 %v391_v13, %v388_v31 }
  0x3c   : > { %900 = vpow2.f32 %v475_v41  ;;  %v401_v30 = vsub.f32 0.0, %v397_v24  ;;  %v373_v33 = vsub.f32 0.0, %v371_v27  ;;  %v407_v34 = vmul.f32 1.442695, %v402_v28  ;;  %v604_v27 = vld [vmem:[%s1178_s11 + $0x18] sm:$0xff]  ;;  %p961_p11 = pnand %p960_p10, %p1118_p4 }
  0x3d   : > { %902 = vpow2.f32 %v473_v42  ;;  %v374_v38 = vsub.f32 0.0, %v372_v32  ;;  %v403_v40 = vsub.f32 0.0, %v399_v35  ;;  %v400_v41 = vadd.f32 %v396_v18, %v395_v36  ;;  %v601_v18 = vld [vmem:[%s1178_s11] sm:$0xff] }
  0x3e   : > { %v405_v37 = vmul.f32 1.442695, %v401_v30  ;;  %v375_v39 = vmul.f32 1.442695, %v373_v33  ;;  %v602_v30 = vld [vmem:[%s1178_s11 + $0x8] sm:$0xff]  ;;  %p962_p13 = pneg %p961_p11 }
  0x3f   : > { %v377_v42 = vmul.f32 1.442695, %v374_v38  ;;  %v606_v38 = vld [vmem:[%s1178_s11 + $0x28] sm:$0xff] }
  0x40   : > { %v889_v43 = vpop.eup %888 }
  0x41   : > { %v891_v44 = vpop.eup %890  ;;  %v479_v45 = vadd.f32 1.0, %v889_v43  ;;  %v409_v43 = vmul.f32 1.442695, %v403_v40 }
  0x42   : > { %v893_v46 = vpop.eup %892  ;;  %v477_v47 = vadd.f32 1.0, %v891_v44  ;;  %v404_v44 = vsub.f32 0.0, %v400_v41  ;;  %v605_v41 = vld [vmem:[%s1178_s11 + $0x20] sm:$0xff] }
  0x43   : > { %v895_v48 = vpop.eup %894  ;;  %904 = vrcp.f32 %v479_v45  ;;  %v480_v49 = vadd.f32 1.0, %v893_v46 }
  0x44   : > { %v897_v50 = vpop.eup %896  ;;  %906 = vrcp.f32 %v477_v47  ;;  %v478_v51 = vadd.f32 1.0, %v895_v48  ;;  %v411_v45 = vmul.f32 1.442695, %v404_v44 }
  0x45   : > { %v899_v52 = vpop.eup %898  ;;  %908 = vrcp.f32 %v480_v49  ;;  %v482_v53 = vadd.f32 1.0, %v897_v50 }
  0x46   : > { %v901_v54 = vpop.eup %900  ;;  %910 = vrcp.f32 %v478_v51  ;;  %v481_v55 = vadd.f32 1.0, %v899_v52 }
  0x47   : > { %v903_v56 = vpop.eup %902  ;;  %912 = vrcp.f32 %v482_v53  ;;  %v484_v57 = vadd.f32 1.0, %v901_v54 }
  0x48   : > { %914 = vrcp.f32 %v481_v55  ;;  %v483_v58 = vadd.f32 1.0, %v903_v56 }
  0x49   : > { %916 = vrcp.f32 %v484_v57  ;;  %v515_v57 = vlaneseq }
  0x4a   : > { %918 = vrcp.f32 %v483_v58 }
  0x4b   : > { %920 = vpow2.f32 %v407_v34 }
  0x4c   : > { %922 = vpow2.f32 %v405_v37 }
  0x4d   : > { %v905_v60 = vpop.eup %904  ;;  %924 = vpow2.f32 %v375_v39 }
  0x4e   : > { %v907_v61 = vpop.eup %906  ;;  %v547_v62 = vmul.f32 %v905_v60, %v544_v59  ;;  %926 = vpow2.f32 %v377_v42 }
  0x4f   : > { %v909_v63 = vpop.eup %908  ;;  %v545_v0 = vmul.f32 %v907_v61, %v544_v59  ;;  %928 = vpow2.f32 %v409_v43  ;;  %v506_v61 = vstv %s806_s29  ;;  %s963_s29 = sshll.u32 %s1045_s27, 4  ;;  %s964_s29 = int_to_ptr.vmem [resolvable:$false] %s963_s29 }
  0x50   : > { %v911_v1 = vpop.eup %910  ;;  %565 = vperm.xlu1 %887, %v547_v62   ;;  %v548_v2 = vmul.f32 %v909_v63, %v544_v59  ;;  %930 = vpow2.f32 %v411_v45  ;;  %p966_p0 = scmp.lt.s32.totalorder %s1211_s13, %s964_s29 }
  0x51   : > { %v913_v3 = vpop.eup %912  ;;  %555 = vperm.xlu0 %886, %v545_v0   ;;  %v546_v4 = vmul.f32 %v911_v1, %v544_v59 }
  0x52   : > { %v915_v5 = vpop.eup %914  ;;  %v550_v6 = vmul.f32 %v913_v3, %v544_v59 }
  0x53   : > { %v917_v7 = vpop.eup %916  ;;  %v549_v8 = vmul.f32 %v915_v5, %v544_v59 }
  0x54   : > { %570 = vperm.xlu1 %887, %v548_v2   ;;  %v919_v9 = vpop.eup %918  ;;  %v552_v10 = vmul.f32 %v917_v7, %v544_v59  ;;  %v502_v2 = vstv %s805_s7  ;;  %s965_s7 = scalar_lea.vmem %s964_s29, 2048 }
  0x55   : > { %560 = vperm.xlu0 %886, %v546_v4   ;;  %v551_v11 = vmul.f32 %v919_v9, %v544_v59  ;;  %v921_v46 = vpop.eup %920  ;;  %v516_v59 = vshrl.u32 %v515_v57, 7  ;;  %p967_p1 = scmp.lt.s32.totalorder %s965_s7, %s959_s25 }
  0x56   : > { %v923_v47 = vpop.eup %922  ;;  %v414_v48 = vadd.f32 1.0, %v921_v46 }
  0x57   : > { %v925_v49 = vpop.eup %924  ;;  %v413_v50 = vadd.f32 1.0, %v923_v47  ;;  %v517_v0 = vsub.s32 0, %v516_v59  ;;  %p968_p2 = por %p967_p1, %p966_p0 }
  0x58   : > { %580 = vperm.xlu1 %887, %v550_v6   ;;  %v927_v51 = vpop.eup %926  ;;  %v379_v52 = vadd.f32 1.0, %v925_v49  ;;  %932 = vrcp.f32 %v414_v48  ;;  %v608_v48 = vld [vmem:[%s1178_s11 + $0x38] sm:$0xff] }
  0x59   : > { %575 = vperm.xlu0 %886, %v549_v8   ;;  %v929_v53 = vpop.eup %928  ;;  %934 = vrcp.f32 %v413_v50  ;;  %v380_v54 = vadd.f32 1.0, %v927_v51  ;;  %v607_v51 = vld [vmem:[%s1178_s11 + $0x30] sm:$0xff]  ;;  %p969_p3 = pnand %p968_p2, %p962_p13 }
  0x5a   : > { %936 = vrcp.f32 %v379_v52  ;;  %v415_v55 = vadd.f32 1.0, %v929_v53  ;;  %v931_v56 = vpop.eup %930 }
  0x5b   : > { %938 = vrcp.f32 %v380_v54  ;;  %v416_v58 = vadd.f32 1.0, %v931_v56 }
  0x5c   : > { %590 = vperm.xlu1 %887, %v552_v10   ;;  %940 = vrcp.f32 %v415_v55 }
  0x5d   : > { %585 = vperm.xlu0 %886, %v551_v11   ;;  %942 = vrcp.f32 %v416_v58 }
  0x62   : > { %v933_v60 = vpop.eup %932 }
  0x63   : > { %v935_v62 = vpop.eup %934  ;;  %v508_v63 = vmul.f32 %v933_v60, %v506_v61 }
  0x64   : > { %v937_v1 = vpop.eup %936  ;;  %v507_v3 = vmul.f32 %v935_v62, %v506_v61 }
  0x65   : > { %v939_v4 = vpop.eup %938  ;;  %v503_v5 = vmul.f32 %v937_v1, %v502_v2  ;;  %v522_v6 = vrot.slane %v508_v63, %v517_v0 }
  0x66   : > { %v941_v7 = vpop.eup %940  ;;  %v518_v8 = vrot.slane %v507_v3, %v517_v0  ;;  %v504_v10 = vmul.f32 %v939_v4, %v502_v2 }
  0x67   : > { %v537_v9 = vadd.f32 %v522_v6, %v503_v5  ;;  %v509_v11 = vmul.f32 %v941_v7, %v506_v61  ;;  %v943_v12 = vpop.eup %942 }
  0x68   : > { %v535_v13 = vadd.f32 %v518_v8, %v503_v5  ;;  %v538_v19 = vadd.f32 %v522_v6, %v504_v10  ;;  %v510_v21 = vmul.f32 %v943_v12, %v506_v61  ;;  %v536_v23 = vadd.f32 %v518_v8, %v504_v10 }
  0x69   : > { %v526_v20 = vrot.slane %v509_v11, %v517_v0 }
  0x6a   : > { %v530_v32 = vrot.slane %v510_v21, %v517_v0 }
  0x6b   : > { %v540_v31 = vadd.f32 %v526_v20, %v504_v10  ;;  %v539_v34 = vadd.f32 %v526_v20, %v503_v5 }
  0x6c   : > { %v542_v42 = vadd.f32 %v530_v32, %v504_v10  ;;  %v541_v44 = vadd.f32 %v530_v32, %v503_v5 }
  0xcf   : > { %v566_v14 = vpop.permute.xlu1 %565 }
  0xd0   : > { %v595_v16 = vadd.f32 %v566_v14, %v537_v9  ;;  %v556_v17 = vpop.permute.xlu0 %555 }
  0xd1   : > { %v593_v22 = vadd.f32 %v556_v17, %v535_v13 }
  0xd2   : > { %v611_v24 = vmul.f32 %v603_v15, %v595_v16 }
  0xd3   : > { %v609_v25 = vmul.f32 %v601_v18, %v593_v22  ;;  %v571_v26 = vpop.permute.xlu1 %570 }
  0xd4   : > { %620 = vst.msk [vmem:[%s1185_s16 + $0x10] sm:$0xff] %vm617_vm0, %v611_v24  ;;  %v596_v28 = vadd.f32 %v571_v26, %v538_v19  ;;  %v561_v29 = vpop.permute.xlu0 %560 }
  0xd5   : > { %618 = vst.msk [vmem:[%s1185_s16] sm:$0xff] %vm617_vm0, %v609_v25  ;;  %v594_v33 = vadd.f32 %v561_v29, %v536_v23 }
  0xd6   : > { %v612_v35 = vmul.f32 %v604_v27, %v596_v28 }
  0xd7   : > { %v610_v36 = vmul.f32 %v602_v30, %v594_v33  ;;  %v581_v37 = vpop.permute.xlu1 %580 }
  0xd8   : > { %621 = vst.msk [vmem:[%s1185_s16 + $0x18] sm:$0xff] %vm617_vm0, %v612_v35  ;;  %v598_v39 = vadd.f32 %v581_v37, %v540_v31  ;;  %v576_v40 = vpop.permute.xlu0 %575 }
  0xd9   : > { %619 = vst.msk [vmem:[%s1185_s16 + $0x8] sm:$0xff] %vm617_vm0, %v610_v36  ;;  %v597_v43 = vadd.f32 %v576_v40, %v539_v34 }
  0xda   : > { %v614_v45 = vmul.f32 %v606_v38, %v598_v39 }
  0xdb   : > { %v613_v46 = vmul.f32 %v605_v41, %v597_v43  ;;  %v591_v47 = vpop.permute.xlu1 %590 }
  0xdc   : > { %623 = vst.msk [vmem:[%s1185_s16 + $0x28] sm:$0xff] %vm617_vm0, %v614_v45  ;;  %v600_v49 = vadd.f32 %v591_v47, %v542_v42  ;;  %v586_v50 = vpop.permute.xlu0 %585 }
  0xdd   : > { %622 = vst.msk [vmem:[%s1185_s16 + $0x20] sm:$0xff] %vm617_vm0, %v613_v46  ;;  %v599_v52 = vadd.f32 %v586_v50, %v541_v44 }
  0xde   : > { %v616_v53 = vmul.f32 %v608_v48, %v600_v49 }
  0xdf   : > { %v615_v54 = vmul.f32 %v607_v51, %v599_v52 }
  0xe0   : > { %625 = vst.msk [vmem:[%s1185_s16 + $0x38] sm:$0xff] %vm617_vm0, %v616_v53 }
  0xe1   : > { %624 = vst.msk [vmem:[%s1185_s16 + $0x30] sm:$0xff] %vm617_vm0, %v615_v54 }
  0xe2   : > { %972 = shalt.err (!%p969_p3)
}
  0xe3   : > { %s973_s8 = scalar_lea.hbm %s1209_s24, 1024  ;;  %s977_s11 = scalar_lea.hbm %s1270_s5, 2048 }
  0xe4   : > { %p974_p5 = scmp.ne.s32.totalorder %s1209_s24, %s973_s8  ;;  %p978_p9 = scmp.lt.u32.totalorder %s1209_s24, %s1270_s5 }
  0xe5   : > { %p979_p12 = scmp.lt.u32.totalorder %s977_s11, %s973_s8  ;;  %p981_p11 = scmp.lt.u32.totalorder %s973_s8, %s1209_s24 }
  0xe6   : > { %p975_p6 = pnand %p974_p5, %p1118_p4 }
  0xe7   : > { %p980_p10 = por %p979_p12, %p978_p9 }
  0xe8   : > { %p976_p7 = pneg %p975_p6 }
  0xe9   : > { %p982_p13 = por %p981_p11, %p980_p10 }
  0xeb   : > { %p983_p0 = pnand %p982_p13, %p976_p7 }
  0xed   : > { %986 = shalt.err (!%p983_p0)
}
  0xee   : > { %s1046_s17 = smov 128   ;;  %s1047_s14 = smov 8  }
  0xef   : > { %821 = dma.vmem_to_hbm [thread:$0]  (%p1118_p4), %s1211_s13, 1024, %s1209_s24, %s1219_s21, %s1046_s17, %s1046_s17, %s1047_s14  }
  0xf0 PF: > { %p833_p1 = scmp.ge.s32.totalorder %s1041_s23, 2  ;;  %s658_s15 = sand.u32 1, %s1021_s18  }
  0xf1   : > { %s659_s25 = scalar_lea.sflag [#allocation3], %s658_s15 }
  0xf2   : > { %p828_p2 = pnand %p833_p1, %p1125_p8 }
  0xf4   : > { %1016 = dma.done.wait (!%p828_p2), %s659_s25, 1024  }
  0xf5   : > { %1018 = vsyncadd (!%p828_p2), %s659_s25, 4294966272  ;;  %s19_s23 = sadd.s32 1, %s1041_s23   ;;  %s1275_s18 = smov %s1025_s19 }
  0xf6   : > { %p16_p3 = scmp.ge.s32.totalorder %s19_s23, 4   ;;  %s1276_s19 = smov %s1029_s20 }
  0xf7   : > { %s1277_s20 = smov %s1131_s6  ;;  %s1278_s21 = smov %s1037_s22 }
  0xf8   : > { %s1279_s22 = smov %s1281_s26  ;;  %18 = sbr.rel (!%p16_p3) target bundleno = 5 (0x5), region = 89 }
  0xff   :  { %664 = vsyncpa [#allocation3], 1 }
 0x100   :  { %666 = vsyncpa [#allocation3 + $0x1], 1 }
 0x101   :  { %667 = vsyncpa [#allocation4], 1 }
 0x102   :  { %669 = vsyncpa [#allocation4 + $0x1], 1 }

// kernel: triplet_attention_forward.2
= control target key start
LH: loop header
LB: loop body
LE: loop exit
PB: predicated region body
PF: predicated region fallthrough
CT: control target
= control target key end

     0   :  { %10 = vsyncpa [#allocation3], 0  ;;  %s2614_s0 = inlined_call_operand.hbm [shape: f32[2,4,16,16], index: 0, kind: input, shape index: {}]   ;;  %s2615_s1 = inlined_call_operand.vmem [shape: f32[30], index: 1, kind: input, shape index: {}]   ;;  %s2616_s2 = inlined_call_operand.vmem [shape: f32[2,16,16], index: 2, kind: output, shape index: {0}]   ;;  %s2617_s3 = inlined_call_operand.vmem [shape: f32[2,4,1,16], index: 3, kind: output, shape index: {1}]   ;;  %s2618_s4 = inlined_call_operand.vmem [shape: f32[2,4,16,1], index: 4, kind: output, shape index: {2}]  }
   0x1   :  { %12 = vsyncpa [#allocation3 + $0x1], 0 }
   0x2   :  { %13 = vsyncpa [#allocation4], 0  ;;  %s1649_s15 = smov 0   ;;  %s1651_s16 = smov 0  }
   0x3   :  { %s1653_s17 = smov 0   ;;  %s1655_s18 = smov 0  }
   0x4 LB: > { %s1668_s19 = sadd.s32 4294967295, %s1618_s18   ;;  %s1671_s20 = sadd.s32 1, %s1618_s18   ;;  %s1618_s18 = sphi %s1655_s18, %s2699_s18   ;;  %s1614_s17 = sphi %s1653_s17, %s2698_s17   ;;  %s1610_s16 = sphi %s1651_s16, %s2697_s16   ;;  %s1606_s15 = sphi %s1649_s15, %s2696_s15  }
   0x5   : > { %s23_s21 = ssub.s32 %s1618_s18, %s1671_s20  ;;  %s26_s22 = sadd.s32 1, %s1614_s17 }
   0x6   : > { %p24_p0 = scmp.eq.s32.totalorder %s23_s21, 0  ;;  %p33_p1 = scmp.ne.s32.totalorder %s1614_s17, %s1610_s16 }
   0x7   : > { %p34_p2 = scmp.eq.s32.totalorder %s1618_s18, 0  ;;  %p39_p3 = scmp.ne.s32.totalorder %s1610_s16, %s1606_s15 }
   0x8   : > { %s1681_s23 = scalar_select %p24_p0, %s1614_s17, %s26_s22  }
   0x9   : > { %p35_p4 = por %p34_p2, %p33_p1  ;;  %p40_p5 = scmp.eq.s32.totalorder %s1668_s19, 0 }
   0xa   : > { %p1435_p6 = scmp.ge.s32.totalorder %s1618_s18, 1  ;;  %p149_p7 = scmp.lt.s32.totalorder %s1618_s18, 3 }
   0xb   : > { %p1688_p8 = por %p40_p5, %p39_p3  ;;  %s162_s28 = sshll.u32 %s2615_s1, 4  ;;  %s163_s28 = int_to_ptr.vmem [resolvable:$true] %s162_s28 }
   0xc   : > { %p1692_p9 = pnand %p1435_p6, %p149_p7  ;;  %p1498_p11 = scmp.lt.s32.totalorder %s1618_s18, 2 }
   0xd   : > { %s2636_s24 = scalar_select %p1688_p8, 1, 0 }
   0xe   : > { %s2637_s25 = scalar_select %p1692_p9, 1, 0 }
   0xf   : > { %p1489_p10 = pneg %p1692_p9  ;;  %s173_s29 = sand.u32 1, %s1614_s17  }
  0x10   : > { %p1709_p13 = pnand %p1498_p11, %p35_p4  ;;  %s1438_s6 = sshll.u32 %s173_s29, 6 }
  0x11   : > { %p1705_p12 = pnand %p1489_p10, %p40_p5  ;;  %s1535_s7 = scalar_lea.vmem %s163_s28, 16 }
  0x12   : > { %p1536_p0 = scmp.ne.s32.totalorder %s163_s28, %s1535_s7  ;;  %p1543_p6 = scmp.lt.s32.totalorder %s163_s28, %s163_s28 }
  0x13   : > { %p1537_p1 = pneg %p1705_p12  ;;  %p1544_p7 = scmp.lt.s32.totalorder %s1535_s7, %s1535_s7 }
  0x15   : > { %p1538_p2 = pnand %p1537_p1, %p1536_p0  ;;  %p1545_p8 = por %p1544_p7, %p1543_p6 }
  0x17   : > { %p1539_p3 = pneg %p1538_p2 }
  0x19   : > { %p1546_p9 = pnand %p1545_p8, %p1539_p3 }
  0x1b   : > { %1549 = shalt.err (!%p1546_p9)
}
  0x1c   : > { %s1620_s8 = smov [#allocation5]   ;;  %s1480_s9 = sshll.u32 %s1618_s18, 10 }
  0x1d   : > { %1492 = dma.vmem_to_smem (!%p1705_p12), %s163_s28, 16, %s1620_s8, [#allocation4]  }
  0x1e   : > { %s1721_s12 = scalar_lea.hbm %s2614_s0, %s1480_s9  ;;  %s177_s13 = scalar_lea.vmem [#allocation2], %s1438_s6 }
  0x1f   : > { %s184_s14 = sshll.u32 %s177_s13, 4  ;;  %s1725_s15 = scalar_lea.sflag [#allocation3], %s173_s29  ;;  %s1723_s14 = int_to_ptr.vmem [resolvable:$true] %s184_s14 }
  0x20   : > { %s1550_s21 = scalar_lea.hbm %s1721_s12, 1024  ;;  %p1552_p8 = pneg %p1709_p13 }
  0x21   : > { %p1551_p4 = scmp.ne.s32.totalorder %s1721_s12, %s1550_s21  ;;  %s1555_s26 = scalar_lea.hbm %s2614_s0, 2048 }
  0x22   : > { %p1556_p11 = scmp.lt.u32.totalorder %s1721_s12, %s2614_s0  ;;  %p1557_p12 = scmp.lt.u32.totalorder %s1555_s26, %s1550_s21 }
  0x23   : > { %p1553_p9 = pnand %p1552_p8, %p1551_p4  ;;  %p1559_p1 = scmp.lt.u32.totalorder %s1550_s21, %s1721_s12 }
  0x24   : > { %p1558_p0 = por %p1557_p12, %p1556_p11 }
  0x25   : > { %p1554_p10 = pneg %p1553_p9 }
  0x26   : > { %p1560_p2 = por %p1559_p1, %p1558_p0 }
  0x28   : > { %p1561_p3 = pnand %p1560_p2, %p1554_p10 }
  0x2a   : > { %1564 = shalt.err (!%p1561_p3)
}
  0x2b   : > { %s1565_s29 = scalar_lea.vmem %s1723_s14, 1024  ;;  %s1621_s30 = smov [#allocation2]  }
  0x2c   : > { %p1566_p6 = scmp.ne.s32.totalorder %s1723_s14, %s1565_s29  ;;  %s1570_s6 = sshll.u32 %s1621_s30, 4  ;;  %s1571_s6 = int_to_ptr.vmem [resolvable:$false] %s1570_s6 }
  0x2d   : > { %s1572_s7 = scalar_lea.vmem %s1571_s6, 2048  ;;  %p1573_p9 = scmp.lt.s32.totalorder %s1723_s14, %s1571_s6 }
  0x2e   : > { %p1568_p7 = pnand %p1566_p6, %p1552_p8  ;;  %p1574_p11 = scmp.lt.s32.totalorder %s1572_s7, %s1565_s29 }
  0x30   : > { %p1569_p4 = pneg %p1568_p7  ;;  %p1575_p12 = por %p1574_p11, %p1573_p9 }
  0x32   : > { %p1576_p0 = pnand %p1575_p12, %p1569_p4 }
  0x34   : > { %1579 = shalt.err (!%p1576_p0)
}
  0x35   : > { %s1622_s8 = smov 128   ;;  %s1623_s9 = smov 8  }
  0x36   : > { %1496 = dma.hbm_to_vmem [thread:$0]  (!%p1709_p13), %s1721_s12, 1024, %s1723_s14, %s1725_s15, %s1622_s8, %s1622_s8, %s1623_s9  }
  0x37   : > { %p2640_p8 = scmp.ne.s32.totalorder %s2637_s25, 0 }
  0x39   : > { %196 = sbr.rel (%p2640_p8) target bundleno = 324 (0x144), region = 28 }
  0x40   : > { %s198_s10 = sand.u32 1, %s1610_s16   ;;  %p2641_p10 = scmp.ne.s32.totalorder %s2636_s24, 0 }
  0x41   : > { %s1442_s11 = sshll.u32 %s198_s10, 6  ;;  %s199_s13 = scalar_lea.sflag [#allocation3], %s198_s10 }
  0x42   : > { %s1756_s21 = scalar_lea.vmem [#allocation2], %s1442_s11 }
  0x43   : > { %1597 = dma.done.wait (%p2641_p10), %s199_s13, 1024  }
  0x44   : > { %1599 = vsyncadd (%p2641_p10), %s199_s13, 4294966272 }
  0x45   : > { %1601 = dma.done.wait (%p40_p5), [#allocation4], 16  }
  0x46   : > { %1603 = vsyncadd (%p40_p5), [#allocation4], 4294967280 }
  0x47   : > { %211 = sfence }
  0x48   : > { %v1767_v0 = vld [vmem:[%s1756_s21 + $0x10] sm:$0xff]  ;;  %vm263_vm0 = vcmask 130048   ;;  %v1770_v1 = vld [vmem:[%s1756_s21] sm:$0xff]  ;;  %v1773_v2 = vld [vmem:[%s1756_s21 + $0x18] sm:$0xff]  ;;  %s1801_s24 = sld [smem:[#allocation5 + $0x6]]  ;;  %s1803_s25 = sld [smem:[#allocation5 + $0x7]] }
  0x49   : > { %v279_v3 = vsel %vm263_vm0, %v1767_v0, 0.0  ;;  %v278_v4 = vsel %vm263_vm0, %v1770_v1, 0.0  ;;  %v286_v5 = vsel %vm263_vm0, %v1773_v2, 0.0  ;;  %v1782_v6 = vld [vmem:[%s1756_s21 + $0x8] sm:$0xff]  ;;  %v1790_v12 = vld [vmem:[%s1756_s21 + $0x20] sm:$0xff]  ;;  %v1793_v13 = vld [vmem:[%s1756_s21 + $0x38] sm:$0xff] }
  0x4a   : > { %650 = vadd.xlane.f32.xlu1 %v279_v3  ;;  %646 = vadd.xlane.f32.xlu0 %v278_v4  ;;  %v505_v7 = vadd.f32 %v286_v5, %v279_v3  ;;  %v285_v8 = vsel %vm263_vm0, %v1782_v6, 0.0  ;;  %v1787_v9 = vld [vmem:[%s1756_s21 + $0x28] sm:$0xff]  ;;  %v281_v16 = vsel %vm263_vm0, %v1790_v12, 0.0  ;;  %v290_v21 = vsel %vm263_vm0, %v1793_v13, 0.0  ;;  %s1805_s5 = sld [smem:[#allocation5 + $0xf]]  ;;  %s1807_s12 = sld [smem:[#allocation5 + $0x10]] }
  0x4b   : > { %v287_v10 = vadd.f32 %v286_v5, %v285_v8  ;;  %v498_v11 = vadd.f32 %v285_v8, %v278_v4  ;;  %v288_v15 = vsel %vm263_vm0, %v1787_v9, 0.0  ;;  %v280_v25 = vadd.f32 %v279_v3, %v278_v4  ;;  %v1810_v27 = vld [vmem:[%s1756_s21 + $0x30] sm:$0xff]  ;;  %s1812_s14 = sld [smem:[#allocation5 + $0x13]]  ;;  %s1814_s15 = sld [smem:[#allocation5 + $0x11]] }
  0x4c   : > { %v506_v14 = vrot.slane %v505_v7, 4  ;;  %v512_v19 = vadd.f32 %v288_v15, %v281_v16  ;;  %s1816_s18 = sld [smem:[#allocation5 + $0x8]]  ;;  %s1818_s22 = sld [smem:[#allocation5 + $0x12]]  ;;  %v283_v34 = vsel %vm263_vm0, %v1810_v27, 0.0  ;;  %vm297_vm1 = vcmask 1041408  }
  0x4d   : > { %v499_v17 = vrot.slane %v498_v11, 4  ;;  %v289_v18 = vadd.f32 %v288_v15, %v287_v10  ;;  %s1820_s26 = sld [smem:[#allocation5 + $0x9]]  ;;  %s1824_s27 = sld [smem:[#allocation5 + $0x5]]  ;;  %v282_v36 = vadd.f32 %v281_v16, %v280_v25  ;;  %v519_v40 = vadd.f32 %v290_v21, %v283_v34 }
  0x4e   : > { %652 = vadd.xlane.f32.xlu1 %v286_v5  ;;  %v507_v20 = vadd.f32 %v506_v14, %v505_v7  ;;  %648 = vadd.xlane.f32.xlu0 %v285_v8  ;;  %v513_v23 = vrot.slane %v512_v19, 4  ;;  %v347_v41 = vstv %s1801_s24  ;;  %v382_v42 = vstv %s1803_s25  ;;  %s1850_s28 = sld [smem:[#allocation5 + $0xa]]  ;;  %s1865_s29 = sld [smem:[#allocation5 + $0xb]] }
  0x4f   : > { %v500_v22 = vadd.f32 %v499_v17, %v498_v11  ;;  %v291_v24 = vadd.f32 %v290_v21, %v289_v18  ;;  %v520_v48 = vrot.slane %v519_v40, 4  ;;  %v284_v50 = vadd.f32 %v283_v34, %v282_v36  ;;  %s1875_s30 = sld [smem:[#allocation5 + $0xc]]  ;;  %s1938_s6 = sld [smem:[#allocation5 + $0xd]] }
  0x50   : > { %v508_v26 = vrot.slane %v507_v20, 2  ;;  %v514_v29 = vadd.f32 %v513_v23, %v512_v19  ;;  %v540_v45 = vstv %s1805_s5  ;;  %v558_v51 = vstv %s1807_s12  ;;  %s1957_s7 = sld [smem:[#allocation5 + $0x1]]  ;;  %s1966_s8 = sld [smem:[#allocation5 + $0x2]] }
  0x51   : > { %v501_v28 = vrot.slane %v500_v22, 2  ;;  %v294_v31 = vmul.f32 0.25, %v291_v24  ;;  %v1831_v49 = vstv %s1812_s14  ;;  %v1840_v55 = vstv %s1814_s15  ;;  %s1968_s9 = sld [smem:[#allocation5 + $0x3]]  ;;  %s1981_s10 = sld [smem:[#allocation5 + $0x4]] }
  0x52   : > { %v509_v30 = vadd.f32 %v508_v26, %v507_v20  ;;  %656 = vadd.xlane.f32.xlu1 %v288_v15  ;;  %654 = vadd.xlane.f32.xlu0 %v281_v16  ;;  %v515_v33 = vrot.slane %v514_v29, 2  ;;  %v417_v52 = vstv %s1816_s18  ;;  %v1843_v56 = vstv %s1818_s22  ;;  %s1983_s11 = sld [smem:[#allocation5 + $0xe]]  ;;  %s1993_s13 = sld [smem:[#allocation5]] }
  0x53   : > { %v502_v32 = vadd.f32 %v501_v28, %v500_v22  ;;  %v309_v37 = vrot.slane %v294_v31, 6  ;;  %v1845_v57 = vmul.f32 0.0, %v540_v45  ;;  %v1848_v58 = vstv %s1820_s26  ;;  %p241_p5 = scmp.lt.s32.totalorder %s1668_s19, 1  ;;  %s1471_s22 = sld [smem:[#allocation5 + $0x1a]] }
  0x54   : > { %v510_v35 = vrot.slane %v509_v30, 1  ;;  %v516_v39 = vadd.f32 %v515_v33, %v514_v29  ;;  %v323_v61 = vstv %s1824_s27  ;;  %v1854_v62 = vmul.f32 0.0, %v1831_v49  ;;  %s1473_s26 = sld [smem:[#allocation5 + $0x1b]]  ;;  %s1475_s27 = sld [smem:[#allocation5 + $0x1c]] }
  0x55   : > { %v503_v38 = vrot.slane %v502_v32, 1  ;;  %v315_v43 = vsel %vm297_vm1, %v309_v37, 0.0  ;;  %v521_v4 = vadd.f32 %v520_v48, %v519_v40  ;;  %v293_v5 = vmul.f32 0.25, %v284_v50  ;;  %s2701_s19 = smov (!%p241_p5, %s1668_s19), 1 }
  0x56   : > { %660 = vadd.xlane.f32.xlu1 %v290_v21  ;;  %658 = vadd.xlane.f32.xlu0 %v283_v34  ;;  %v511_v44 = vadd.f32 %v510_v35, %v509_v30  ;;  %v517_v46 = vrot.slane %v516_v39, 1  ;;  %v1835_v53 = vmul.f32 %v347_v41, %v315_v43  ;;  %v1837_v54 = vmul.f32 %v382_v42, %v315_v43  ;;  %s1446_s21 = sshll.u32 %s2701_s19, 2  ;;  %s1481_s12 = sshll.u32 %s2701_s19, 4 }
  0x57   : > { %v504_v47 = vadd.f32 %v503_v38, %v502_v32  ;;  %v1856_v3 = vmul.f32 %v417_v52, %v315_v43  ;;  %v1863_v11 = vmul.f32 %v1848_v58, %v315_v43  ;;  %v522_v14 = vrot.slane %v521_v4, 2  ;;  %s2109_s5 = scalar_lea.vmem %s2617_s3, %s1446_s21  ;;  %s245_s18 = scalar_lea.vmem %s2616_s2, %s1481_s12 }
  0x58   : > { %v528_v59 = vmul.f32 0.0625, %v511_v44  ;;  %v518_v60 = vadd.f32 %v517_v46, %v516_v39  ;;  %v357_v8 = vrot.slane %v1835_v53, 1  ;;  %v392_v10 = vrot.slane %v1837_v54, 2 }
  0x59   : > { %v527_v63 = vmul.f32 0.0625, %v504_v47  ;;  %2642 = vst [vmem:[#allocation8_spill] sm:$0xff] %v1863_v11  ;;  %v308_v15 = vrot.slane %v293_v5, 6  ;;  %v1869_v16 = vsel %vm263_vm0, %v1782_v6, -inf  ;;  %v1873_v17 = vsel %vm263_vm0, %v1770_v1, -inf }
  0x5a   : > { %v1858_v7 = vmul.f32 %v558_v51, %v528_v59  ;;  %v1878_v18 = vmul.f32 %v1840_v55, %v528_v59  ;;  %v1881_v19 = vmul.f32 %v1843_v56, %v528_v59  ;;  %v1883_v20 = vmul.f32 %v540_v45, %v528_v59  ;;  %632 = vmax.xlane.f32.xlu1 %v1869_v16 }
  0x5b   : > { %v529_v21 = vmul.f32 0.0625, %v518_v60  ;;  %vm336_vm2 = vcmask 1046528   ;;  %630 = vmax.xlane.f32.xlu0 %v1873_v17  ;;  %v1887_v6 = vmul.f32 %v540_v45, %v527_v63  ;;  %v523_v1 = vadd.f32 %v522_v14, %v521_v4 }
  0x5c   : > { %v310_v22 = vsel %vm297_vm1, %v308_v15, %v309_v37  ;;  %v314_v23 = vsel %vm297_vm1, 0.0, %v308_v15  ;;  %v1891_v24 = vmul.f32 %v558_v51, %v527_v63  ;;  %v1894_v25 = vmul.f32 %v1840_v55, %v527_v63 }
  0x5d   : > { %v348_v26 = vmul.f32 %v347_v41, %v314_v23  ;;  %v349_v28 = vmul.f32 %v347_v41, %v310_v22  ;;  %v524_v31 = vrot.slane %v523_v1, 1  ;;  %v1899_v32 = vstv %s1850_s28  ;;  %s1477_s28 = sld [smem:[#allocation5 + $0x1d]] }
  0x5e   : > { %v1901_v33 = vmul.f32 %v558_v51, %v529_v21  ;;  %v1904_v34 = vmul.f32 %v1840_v55, %v529_v21  ;;  %vm371_vm3 = vcmask 1045504   ;;  %v383_v35 = vmul.f32 %v382_v42, %v314_v23 }
  0x5f   : > { %v384_v36 = vmul.f32 %v382_v42, %v310_v22  ;;  %v354_v37 = vrot.slane %v348_v26, 1  ;;  %v355_v38 = vrot.slane %v349_v28, 1  ;;  %v1906_v39 = vmul.f32 %v417_v52, %v314_v23 }
  0x60   : > { %v1908_v40 = vmul.f32 %v417_v52, %v310_v22  ;;  %v1911_v41 = vmul.f32 %v1843_v56, %v529_v21  ;;  %v1914_v43 = vmul.f32 %v1831_v49, %v529_v21  ;;  %v533_v44 = vmul.f32 0.0, %v1899_v32 }
  0x61   : > { %v1918_v45 = vstv %s1865_s29  ;;  %v525_v46 = vadd.f32 %v524_v31, %v523_v1  ;;  %v1920_v47 = vmul.f32 %v323_v61, %v314_v23  ;;  %v559_v42 = vmul.f32 0.0, %v558_v51  ;;  %s1469_s29 = sld [smem:[#allocation5 + $0x19]] }
  0x62   : > { %v1923_v48 = vstv %s1875_s30  ;;  %v1925_v50 = vmul.f32 %v323_v61, %v310_v22  ;;  %v389_v52 = vrot.slane %v383_v35, 2  ;;  %v390_v53 = vrot.slane %v384_v36, 2  ;;  %s1470_s30 = sld [smem:[#allocation5 + $0x15]] }
  0x63   : > { %v1928_v59 = vmul.f32 %v1848_v58, %v314_v23  ;;  %v1931_v60 = vsel %vm336_vm2, %v354_v37, %v355_v38  ;;  %v1934_v63 = vsel %vm336_vm2, %v355_v38, %v357_v8  ;;  %v1941_v51 = vadd.f32 %v1845_v57, %v533_v44 }
  0x64   : > { %v549_v61 = vmul.f32 0.0, %v1918_v45  ;;  %v470_v14 = vmax.f32 %v1873_v17, %v1869_v16  ;;  %v272_v15 = vsel %vm263_vm0, %v1773_v2, -inf  ;;  %v530_v21 = vmul.f32 0.0625, %v525_v46 }
  0x65   : > { %v1949_v8 = vmul.f32 %v1848_v58, %v310_v22  ;;  %636 = vmax.xlane.f32.xlu1 %v272_v15  ;;  %v1953_v1 = vsel %vm263_vm0, %v1767_v0, -inf  ;;  %v273_v57 = vsel %vm263_vm0, %v1787_v9, -inf  ;;  %v1964_v58 = vsel %vm263_vm0, %v1790_v12, -inf }
  0x66   : > { %v471_v23 = vrot.slane %v470_v14, 4  ;;  %v477_v26 = vmax.f32 %v1953_v1, %v272_v15  ;;  %634 = vmax.xlane.f32.xlu0 %v1953_v1  ;;  %v274_v2 = vmax.f32 %v1869_v16, %v273_v57  ;;  %v1971_v0 = vsel %vm371_vm3, %v389_v52, %v390_v53 }
  0x67   : > { %v1976_v9 = vsel %vm371_vm3, %v390_v53, %v392_v10  ;;  %v484_v22 = vmax.f32 %v1964_v58, %v273_v57  ;;  %v275_v16 = vsel %vm263_vm0, %v1793_v13, -inf  ;;  %v553_v12 = vadd.f32 %v549_v61, %v1941_v51 }
  0x68   : > { %v472_v28 = vmax.f32 %v470_v14, %v471_v23  ;;  %v478_v31 = vrot.slane %v477_v26, 4  ;;  %v276_v35 = vmax.f32 %v272_v15, %v275_v16  ;;  %v1987_v54 = vmul.f32 %v1840_v55, %v530_v21 }
  0x69   : > { %v1990_v10 = vmul.f32 %v1843_v56, %v530_v21  ;;  %640 = vmax.xlane.f32.xlu1 %v273_v57  ;;  %v485_v13 = vrot.slane %v484_v22, 4  ;;  %v268_v55 = vsel %vm263_vm0, %v1810_v27, -inf  ;;  %v2001_v46 = vmul.f32 %v1831_v49, %v530_v21 }
  0x6a   : > { %v473_v37 = vrot.slane %v472_v28, 2  ;;  %v479_v38 = vmax.f32 %v477_v26, %v478_v31  ;;  %638 = vmax.xlane.f32.xlu0 %v1964_v58  ;;  %v1996_v44 = vmax.f32 %v274_v2, %v276_v35  ;;  %v2004_v52 = vstv %s1938_s6  ;;  %s1472_s6 = sld [smem:[#allocation5 + $0x16]] }
  0x6b   : > { %v486_v53 = vmax.f32 %v484_v22, %v485_v13  ;;  %v491_v61 = vmax.f32 %v268_v55, %v275_v16  ;;  %v563_v14 = vadd.f32 %v559_v42, %v553_v12  ;;  %v267_v27 = vmax.f32 %v1873_v17, %v1964_v58 }
  0x6c   : > { %v474_v15 = vmax.f32 %v472_v28, %v473_v37  ;;  %v480_v57 = vrot.slane %v479_v38, 2  ;;  %v2621_v23 = vrot.slane %v1996_v44, 6  ;;  %v2010_v2 = vstv %s1957_s7  ;;  %s1474_s7 = sld [smem:[#allocation5 + $0x17]] }
  0x6d   : > { %v487_v26 = vrot.slane %v486_v53, 2  ;;  %644 = vmax.xlane.f32.xlu1 %v275_v16  ;;  %v492_v49 = vrot.slane %v491_v61, 4  ;;  %v2013_v22 = vstv %s1966_s8  ;;  %v2016_v35 = vstv %s1968_s9  ;;  %s1476_s8 = sld [smem:[#allocation5 + $0x18]]  ;;  %s1468_s9 = sld [smem:[#allocation5 + $0x14]] }
  0x6e   : > { %v475_v21 = vrot.slane %v474_v15, 1  ;;  %v481_v31 = vmax.f32 %v479_v38, %v480_v57  ;;  %642 = vmax.xlane.f32.xlu0 %v268_v55  ;;  %v2019_v12 = vstv %s1981_s10  ;;  %v269_v28 = vmax.f32 %v1953_v1, %v268_v55  ;;  %s1482_s10 = sshll.u32 %s2701_s19, 6 }
  0x6f   : > { %v488_v42 = vmax.f32 %v486_v53, %v487_v26  ;;  %v2023_v13 = vstv %s1983_s11  ;;  %v305_v16 = vsel %vm297_vm1, %v2621_v23, 0.0  ;;  %v493_v37 = vmax.f32 %v491_v61, %v492_v49 }
  0x70   : > { %v476_v17 = vmax.f32 %v474_v15, %v475_v21  ;;  %v482_v58 = vrot.slane %v481_v31, 1  ;;  %v317_v57 = vstv %s1993_s13  ;;  %v2030_v30 = vmul.f32 0.0, %v2004_v52  ;;  %s2463_s13 = scalar_lea.vmem %s2618_s4, %s1482_s10 }
  0x71   : > { %v489_v38 = vrot.slane %v488_v42, 1  ;;  %v2033_v53 = vmul.f32 0.0, %v1843_v56  ;;  %v2039_v36 = vmul.f32 %v2010_v2, %v305_v16  ;;  %v494_v61 = vrot.slane %v493_v37, 2 }
  0x72   : > { %v534_v26 = vmul.f32 %v1899_v32, %v476_v17  ;;  %v550_v1 = vmul.f32 %v1918_v45, %v476_v17  ;;  %v569_v55 = vmul.f32 %v1923_v48, %v476_v17  ;;  %v483_v15 = vmax.f32 %v481_v31, %v482_v58 }
  0x73   : > { %v490_v21 = vmax.f32 %v488_v42, %v489_v38  ;;  %v2042_v49 = vmul.f32 0.0, %v2023_v13  ;;  %vm406_vm4 = vcmask 1044480   ;;  %vm625_vm5 = vcmask 122880  }
  0x74   : > { %v545_v29 = vadd.f32 %v1887_v6, %v534_v26  ;;  %v554_v56 = vadd.f32 %v550_v1, %v1941_v51  ;;  %v573_v4 = vadd.f32 %v569_v55, %v563_v14  ;;  %v535_v5 = vmul.f32 %v1899_v32, %v483_v15 }
  0x75   : > { %v551_v23 = vmul.f32 %v1918_v45, %v483_v15  ;;  %v570_v17 = vmul.f32 %v1923_v48, %v483_v15  ;;  %v589_v31 = vmul.f32 %v2004_v52, %v483_v15  ;;  %v552_v42 = vmul.f32 %v1918_v45, %v490_v21 }
  0x76   : > { %v564_v58 = vadd.f32 %v1891_v24, %v554_v56  ;;  %v583_v38 = vadd.f32 %v1894_v25, %v573_v4  ;;  %v546_v11 = vadd.f32 %v1883_v20, %v535_v5  ;;  %v367_v6 = vmul.f32 %v2013_v22, %v305_v16 }
  0x77   : > { %v555_v51 = vadd.f32 %v551_v23, %v545_v29  ;;  %v2056_v14 = vmul.f32 %v2016_v35, %v305_v16  ;;  %v2059_v32 = vmul.f32 %v2019_v12, %v305_v16  ;;  %v495_v26 = vmax.f32 %v493_v37, %v494_v61 }
  0x78   : > { %v574_v1 = vadd.f32 %v570_v17, %v564_v58  ;;  %v593_v55 = vadd.f32 %v589_v31, %v583_v38  ;;  %v556_v15 = vadd.f32 %v552_v42, %v546_v11  ;;  %v270_v45 = vmax.f32 %v267_v27, %v269_v28 }
  0x79   : > { %v571_v24 = vmul.f32 %v1923_v48, %v490_v21  ;;  %v590_v25 = vmul.f32 %v2004_v52, %v490_v21  ;;  %v565_v20 = vadd.f32 %v1858_v7, %v555_v51  ;;  %v496_v4 = vrot.slane %v495_v26, 1 }
  0x7a   : > { %v584_v29 = vadd.f32 %v1878_v18, %v574_v1  ;;  %v340_v5 = vrot.slane %v2039_v36, 1  ;;  %v375_v23 = vrot.slane %v367_v6, 2  ;;  %v298_v16 = vrot.slane %v270_v45, 6 }
  0x7b   : > { %v410_v37 = vrot.slane %v2056_v14, 3  ;;  %v445_v61 = vrot.slane %v2059_v32, 4  ;;  %v497_v11 = vmax.f32 %v495_v26, %v496_v4  ;;  %v566_v27 = vadd.f32 %v1901_v33, %v556_v15 }
  0x7c   : > { %v603_v28 = vadd.f32 %v1881_v19, %v593_v55  ;;  %v609_v56 = vmul.f32 %v2023_v13, %v490_v21  ;;  %v2643_v7 = vrot.slane %v1996_v44, 6  ;;  %v304_v17 = vsel %vm297_vm1, 0.0, %v298_v16 }
  0x7d   : > { %v575_v36 = vadd.f32 %v571_v24, %v565_v20  ;;  %v594_v31 = vadd.f32 %v590_v25, %v584_v29  ;;  %v572_v42 = vmul.f32 %v1923_v48, %v497_v11  ;;  %v318_v58 = vmul.f32 %v317_v57, %v304_v17 }
  0x7e   : > { %v300_v18 = vsel %vm297_vm1, %v298_v16, %v2643_v7  ;;  %v330_v6 = vmul.f32 %v2010_v2, %v304_v17  ;;  %v365_v33 = vmul.f32 %v2013_v22, %v304_v17  ;;  %v400_v14 = vmul.f32 %v2016_v35, %v304_v17 }
  0x7f   : > { %v319_v38 = vmul.f32 %v317_v57, %v300_v18  ;;  %v331_v19 = vmul.f32 %v2010_v2, %v300_v18  ;;  %v576_v44 = vadd.f32 %v572_v42, %v566_v27  ;;  %v326_v21 = vadd.f32 %v1920_v47, %v318_v58 }
  0x80   : > { %v366_v51 = vmul.f32 %v2013_v22, %v300_v18  ;;  %v337_v26 = vrot.slane %v330_v6, 1  ;;  %v372_v1 = vrot.slane %v365_v33, 2  ;;  %v401_v2 = vmul.f32 %v2016_v35, %v300_v18 }
  0x81   : > { %v327_v48 = vadd.f32 %v1925_v50, %v319_v38  ;;  %v338_v57 = vrot.slane %v331_v19, 1  ;;  %v586_v55 = vadd.f32 %v1987_v54, %v576_v44  ;;  %v612_v45 = vadd.f32 %v609_v56, %v603_v28 }
  0x82   : > { %v373_v15 = vrot.slane %v366_v51, 2  ;;  %v435_v24 = vmul.f32 %v2019_v12, %v304_v17  ;;  %v436_v50 = vmul.f32 %v2019_v12, %v300_v18  ;;  %v591_v25 = vmul.f32 %v2004_v52, %v497_v11 }
  0x83   : > { %v339_v47 = vsel %vm336_vm2, %v337_v26, %v338_v57  ;;  %v341_v22 = vsel %vm336_vm2, %v338_v57, %v340_v5  ;;  %v596_v54 = vadd.f32 %v2030_v30, %v586_v55  ;;  %v407_v16 = vrot.slane %v400_v14, 3 }
  0x84   : > { %v344_v20 = vadd.f32 %v339_v47, %v326_v21  ;;  %v345_v4 = vadd.f32 %v341_v22, %v327_v48  ;;  %v374_v35 = vsel %vm371_vm3, %v372_v1, %v373_v15  ;;  %v376_v29 = vsel %vm371_vm3, %v373_v15, %v375_v23 }
  0x85   : > { %v408_v27 = vrot.slane %v401_v2, 3  ;;  %v606_v28 = vadd.f32 %v2033_v53, %v596_v54  ;;  %v585_v12 = vadd.f32 %v1904_v34, %v575_v36  ;;  %v610_v52 = vmul.f32 %v2023_v13, %v497_v11 }
  0x86   : > { %v361_v5 = vadd.f32 %v1931_v60, %v344_v20  ;;  %v362_v56 = vadd.f32 %v1934_v63, %v345_v4  ;;  %v442_v30 = vrot.slane %v435_v24, 4  ;;  %v443_v7 = vrot.slane %v436_v50, 4 }
  0x87   : > { %v615_v18 = vadd.f32 %v2042_v49, %v606_v28  ;;  %v595_v60 = vadd.f32 %v591_v25, %v585_v12  ;;  %v409_v63 = vsel %vm406_vm4, %v407_v16, %v408_v27  ;;  %v411_v34 = vsel %vm406_vm4, %v408_v27, %v410_v37 }
  0x88   : > { %v379_v53 = vadd.f32 %v374_v35, %v361_v5  ;;  %v380_v23 = vadd.f32 %v376_v29, %v362_v56  ;;  %v604_v13 = vadd.f32 %v1911_v41, %v594_v31  ;;  %v621_v11 = vadd.f32 %v1914_v43, %v612_v45 }
  0x89   : > { %v624_v17 = vadd.f32 %v1854_v62, %v615_v18  ;;  %v605_v58 = vadd.f32 %v1990_v10, %v595_v60  ;;  %v2644_v38 = vrot.slane %v1908_v40, 3  ;;  %v2645_v6 = vrot.slane %v1906_v39, 3 }
  0x8a   : > { %v396_v36 = vadd.f32 %v1971_v0, %v379_v53  ;;  %v397_v42 = vadd.f32 %v1976_v9, %v380_v23  ;;  %v2646_v19 = vrot.slane %v1856_v3, 3  ;;  %v460_v31 = vrot.slane %v1949_v8, 4  ;;  %626 = vst.msk [vmem:[%s2109_s5] sm:$0x1] %vm625_vm5, %v621_v11 }
  0x8b   : > { %v426_v37 = vsel %vm406_vm4, %v2645_v6, %v2644_v38  ;;  %v2647_v41 = vmov %v2644_v38  ;;  %v613_v0 = vadd.f32 %v610_v52, %v604_v13  ;;  %vm441_vm6 = vcmask 1043456   ;;  %629 = vst.msk [vmem:[%s2109_s5 + $0x3] sm:$0x1] %vm625_vm5, %v624_v17 }
  0x8c   : > { %v428_v43 = vsel %vm406_vm4, %v2647_v41, %v2646_v19  ;;  %v414_v9 = vadd.f32 %v409_v63, %v396_v36  ;;  %v415_v10 = vadd.f32 %v411_v34, %v397_v42  ;;  %v614_v39 = vadd.f32 %v2042_v49, %v605_v58  ;;  %v2649_v49 = vld [vmem:[#allocation8_spill] sm:$0xff] }
  0x8d   : > { %v444_v3 = vsel %vm441_vm6, %v442_v30, %v443_v7  ;;  %v446_v40 = vsel %vm441_vm6, %v443_v7, %v445_v61  ;;  %v622_v8 = vadd.f32 %v2001_v46, %v613_v0  ;;  %v2648_v51 = vrot.slane %v1928_v59, 4 }
  0x8e   : > { %v431_v33 = vadd.f32 %v426_v37, %v414_v9  ;;  %v432_v44 = vadd.f32 %v428_v43, %v415_v10  ;;  %v623_v21 = vadd.f32 %v1854_v62, %v614_v39  ;;  %v2650_v48 = vrot.slane %v2649_v49, 4 }
  0x8f   : > { %v461_v14 = vsel %vm441_vm6, %v2648_v51, %v460_v31  ;;  %627 = vst.msk [vmem:[%s2109_s5 + $0x1] sm:$0x1] %vm625_vm5, %v622_v8  ;;  %v2157_v24 = vstv %s1471_s22  ;;  %v2159_v50 = vstv %s1473_s26  ;;  %v2162_v54 = vstv %s1475_s27 }
  0x90   : > { %v463_v26 = vsel %vm441_vm6, %v460_v31, %v2650_v48  ;;  %v449_v32 = vadd.f32 %v444_v3, %v431_v33  ;;  %v450_v57 = vadd.f32 %v446_v40, %v432_v44  ;;  %628 = vst.msk [vmem:[%s2109_s5 + $0x2] sm:$0x1] %vm625_vm5, %v623_v21  ;;  %v2164_v20 = vstv %s1477_s28 }
  0x91   : > { %2651 = vst [vmem:[#allocation8_spill] sm:$0xff] %v2164_v20  ;;  %v2167_v35 = vstv %s1469_s29  ;;  %v2169_v16 = vstv %s1470_s30  ;;  %v2175_v56 = vstv %s1472_s6  ;;  %v2186_v7 = vstv %s1474_s7 }
  0x92   : > { %v466_v46 = vadd.f32 %v461_v14, %v449_v32  ;;  %v467_v62 = vadd.f32 %v463_v26, %v450_v57  ;;  %v2199_v13 = vstv %s1476_s8  ;;  %v2201_v11 = vstv %s1468_s9 }
  0x93   : > { %vm1282_vm7 = vcmask 7168  }
  0x94   : > { %468 = vst.msk [vmem:[%s245_s18] sm:$0xff] %vm263_vm0, %v466_v46  ;;  %469 = vst.msk [vmem:[%s245_s18 + $0x8] sm:$0xff] %vm263_vm0, %v467_v62 }
  0xd7   : > { %v651_v59 = vpop.xlane.xlu1 %650  ;;  %v647_v61 = vpop.xlane.xlu0 %646 }
  0xd8   : > { %v664_v1 = vmul.f32 0.0625, %v651_v59  ;;  %v662_v55 = vmul.f32 0.0625, %v647_v61 }
  0xda   : > { %v721_v15 = vrot.slane %v664_v1, 6  ;;  %v718_v2 = vrot.slane %v662_v55, 6 }
  0xdb   : > { %v653_v45 = vpop.xlane.xlu1 %652  ;;  %v649_v22 = vpop.xlane.xlu0 %648 }
  0xdc   : > { %v665_v47 = vmul.f32 0.0625, %v653_v45  ;;  %v743_v25 = vsel %vm297_vm1, 0.0, %v721_v15  ;;  %v742_v4 = vsel %vm297_vm1, 0.0, %v718_v2  ;;  %v663_v29 = vmul.f32 0.0625, %v649_v22 }
  0xdd   : > { %v2172_v27 = vmul.f32 %v2157_v24, %v743_v25  ;;  %v977_v28 = vmul.f32 %v2159_v50, %v743_v25  ;;  %v2178_v12 = vmul.f32 %v2162_v54, %v743_v25  ;;  %v2181_v52 = vmul.f32 %v2164_v20, %v743_v25 }
  0xde   : > { %v722_v5 = vrot.slane %v665_v47, 6  ;;  %v2184_v30 = vmul.f32 %v2157_v24, %v742_v4  ;;  %v2189_v18 = vmul.f32 %v2159_v50, %v742_v4  ;;  %v2192_v53 = vmul.f32 %v2162_v54, %v742_v4 }
  0xdf   : > { %v2197_v63 = vmul.f32 %v2167_v35, %v743_v25  ;;  %v719_v34 = vrot.slane %v663_v29, 6  ;;  %v1003_v36 = vrot.slane %v977_v28, 2  ;;  %v2205_v42 = vmul.f32 %v2167_v35, %v742_v4  ;;  %v657_v41 = vpop.xlane.xlu1 %656  ;;  %v655_v8 = vpop.xlane.xlu0 %654 }
  0xe0   : > { %v723_v23 = vsel %vm297_vm1, %v721_v15, %v722_v5  ;;  %v747_v60 = vsel %vm297_vm1, %v722_v5, 0.0  ;;  %v2208_v58 = vmul.f32 %v2164_v20, %v742_v4  ;;  %v1127_v38 = vrot.slane %v2178_v12, 3 }
  0xe1   : > { %v2212_v6 = vmul.f32 %v2157_v24, %v723_v23  ;;  %v855_v37 = vmul.f32 %v2157_v24, %v747_v60  ;;  %v978_v19 = vmul.f32 %v2159_v50, %v723_v23  ;;  %v1251_v43 = vrot.slane %v2181_v52, 4 }
  0xe2   : > { %v998_v0 = vrot.slane %v2189_v18, 2  ;;  %v1122_v9 = vrot.slane %v2192_v53, 3  ;;  %v979_v10 = vmul.f32 %v2159_v50, %v747_v60  ;;  %v1102_v39 = vmul.f32 %v2162_v54, %v723_v23 }
  0xe3   : > { %v720_v3 = vsel %vm297_vm1, %v718_v2, %v719_v34  ;;  %v746_v40 = vsel %vm297_vm1, %v719_v34, 0.0  ;;  %v1246_v33 = vrot.slane %v2208_v58, 4  ;;  %v1103_v44 = vmul.f32 %v2162_v54, %v747_v60  ;;  %v661_v34 = vpop.xlane.xlu1 %660 }
  0xe4   : > { %v1226_v21 = vmul.f32 %v2164_v20, %v723_v23  ;;  %v667_v51 = vmul.f32 0.0625, %v657_v41  ;;  %v2623_v14 = vrot.slane %v2212_v6, 1  ;;  %v882_v49 = vrot.slane %v855_v37, 1 }
  0xe5   : > { %v1004_v48 = vrot.slane %v978_v19, 2  ;;  %v1227_v26 = vmul.f32 %v2164_v20, %v747_v60  ;;  %v2230_v32 = vmul.f32 %v2167_v35, %v723_v23  ;;  %v2233_v57 = vmul.f32 %v2157_v24, %v720_v3 }
  0xe6   : > { %v852_v46 = vmul.f32 %v2157_v24, %v746_v40  ;;  %v666_v62 = vmul.f32 0.0625, %v655_v8  ;;  %v1006_v59 = vrot.slane %v979_v10, 2  ;;  %v1128_v61 = vrot.slane %v1102_v39, 3 }
  0xe7   : > { %v975_v1 = vmul.f32 %v2159_v50, %v720_v3  ;;  %v976_v55 = vmul.f32 %v2159_v50, %v746_v40  ;;  %v1130_v15 = vrot.slane %v1103_v44, 3  ;;  %v1252_v2 = vrot.slane %v1226_v21, 4 }
  0xe8   : > { %v1099_v45 = vmul.f32 %v2162_v54, %v720_v3  ;;  %v1100_v47 = vmul.f32 %v2162_v54, %v746_v40  ;;  %v2243_v22 = vsel %vm336_vm2, %v2623_v14, %v882_v49  ;;  %v2246_v25 = vsel %vm371_vm3, %v1003_v36, %v1004_v48 }
  0xe9   : > { %v1254_v4 = vrot.slane %v1227_v26, 4  ;;  %v725_v29 = vrot.slane %v667_v51, 6  ;;  %v2249_v28 = vmul.f32 %v2167_v35, %v720_v3  ;;  %v2624_v5 = vrot.slane %v2233_v57, 1  ;;  %v659_v51 = vpop.xlane.xlu0 %658 }
  0xea   : > { %v877_v12 = vrot.slane %v852_v46, 1  ;;  %v1223_v52 = vmul.f32 %v2164_v20, %v720_v3  ;;  %v999_v18 = vrot.slane %v975_v1, 2  ;;  %v1001_v53 = vrot.slane %v976_v55, 2 }
  0xeb   : > { %v1224_v23 = vmul.f32 %v2164_v20, %v746_v40  ;;  %v724_v60 = vrot.slane %v666_v62, 6  ;;  %v2255_v37 = vsel %vm371_vm3, %v1004_v48, %v1006_v59  ;;  %v2258_v36 = vsel %vm406_vm4, %v1127_v38, %v1128_v61 }
  0xec   : > { %v1123_v19 = vrot.slane %v1099_v45, 3  ;;  %v1125_v41 = vrot.slane %v1100_v47, 3  ;;  %v2261_v10 = vsel %vm406_vm4, %v1128_v61, %v1130_v15  ;;  %v2264_v39 = vsel %vm441_vm6, %v1251_v43, %v1252_v2 }
  0xed   : > { %v726_v3 = vsel %vm297_vm1, %v724_v60, %v725_v29  ;;  %v744_v40 = vsel %vm297_vm1, 0.0, %v724_v60  ;;  %v2269_v8 = vsel %vm441_vm6, %v1252_v2, %v1254_v4  ;;  %v1247_v44 = vrot.slane %v1223_v52, 4 }
  0xee   : > { %2652 = vst [vmem:[#allocation9_spill] sm:$0xff] %v2269_v8  ;;  %v748_v21 = vsel %vm297_vm1, %v725_v29, 0.0  ;;  %v669_v38 = vmul.f32 0.0625, %v661_v34  ;;  %v2275_v49 = vsel %vm336_vm2, %v2624_v5, %v877_v12  ;;  %v2278_v43 = vsel %vm371_vm3, %v998_v0, %v999_v18 }
  0xef   : > { %v2281_v48 = vsel %vm371_vm3, %v999_v18, %v1001_v53  ;;  %v1249_v26 = vrot.slane %v1224_v23, 4  ;;  %v2284_v46 = vsel %vm406_vm4, %v1122_v9, %v1123_v19  ;;  %v2287_v62 = vsel %vm406_vm4, %v1123_v19, %v1125_v41 }
  0xf0   : > { %v856_v59 = vmul.f32 %v2157_v24, %v744_v40  ;;  %v857_v61 = vmul.f32 %v2157_v24, %v726_v3  ;;  %v858_v1 = vmul.f32 %v2157_v24, %v748_v21  ;;  %v982_v55 = vmul.f32 %v2159_v50, %v748_v21 }
  0xf1   : > { %v980_v0 = vmul.f32 %v2159_v50, %v744_v40  ;;  %v668_v15 = vmul.f32 0.0625, %v659_v51  ;;  %v981_v2 = vmul.f32 %v2159_v50, %v726_v3  ;;  %v1104_v45 = vmul.f32 %v2162_v54, %v744_v40 }
  0xf2   : > { %v1105_v9 = vmul.f32 %v2162_v54, %v726_v3  ;;  %v728_v47 = vrot.slane %v669_v38, 6  ;;  %v1106_v4 = vmul.f32 %v2162_v54, %v748_v21  ;;  %v1230_v29 = vmul.f32 %v2164_v20, %v748_v21 }
  0xf3   : > { %v1228_v12 = vmul.f32 %v2164_v20, %v744_v40  ;;  %v1229_v52 = vmul.f32 %v2164_v20, %v726_v3  ;;  %v2304_v18 = vsel %vm441_vm6, %v1246_v33, %v1247_v44  ;;  %v2307_v53 = vsel %vm441_vm6, %v1247_v44, %v1249_v26 }
  0xf4   : > { %v884_v23 = vrot.slane %v856_v59, 1  ;;  %v885_v60 = vrot.slane %v857_v61, 1  ;;  %v887_v34 = vrot.slane %v858_v1, 1  ;;  %v1011_v19 = vrot.slane %v982_v55, 2  ;;  %v633_v61 = vpop.xlane.xlu1 %632 }
  0xf5   : > { %v1008_v41 = vrot.slane %v980_v0, 2  ;;  %v727_v38 = vrot.slane %v668_v15, 6  ;;  %v1009_v51 = vrot.slane %v981_v2, 2  ;;  %v1132_v21 = vrot.slane %v1104_v45, 3 }
  0xf6   : > { %v1133_v17 = vrot.slane %v1105_v9, 3  ;;  %v749_v14 = vsel %vm297_vm1, %v728_v47, 0.0  ;;  %v1135_v31 = vrot.slane %v1106_v4, 3  ;;  %v1259_v5 = vrot.slane %v1230_v29, 4 }
  0xf7   : > { %v1256_v58 = vrot.slane %v1228_v12, 4  ;;  %v1257_v8 = vrot.slane %v1229_v52, 4  ;;  %v2311_v33 = vmul.f32 %v2167_v35, %v744_v40  ;;  %v2314_v44 = vmul.f32 %v2167_v35, %v726_v3 }
  0xf8   : > { %v2317_v26 = vsel %vm336_vm2, %v884_v23, %v885_v60  ;;  %v2320_v59 = vsel %vm297_vm1, 0.0, %v727_v38  ;;  %v2323_v1 = vmul.f32 %v2157_v24, %v749_v14  ;;  %v2326_v55 = vmul.f32 %v2159_v50, %v749_v14 }
  0xf9   : > { %2653 = vst [vmem:[#allocation10_spill] sm:$0xff] %v2320_v59  ;;  %v2329_v0 = vmul.f32 %v2162_v54, %v749_v14  ;;  %v2332_v40 = vsel %vm297_vm1, %v727_v38, %v728_v47  ;;  %v2335_v3 = vsel %vm336_vm2, %v885_v60, %v887_v34  ;;  %v2338_v15 = vsel %vm371_vm3, %v1008_v41, %v1009_v51  ;;  %v631_v34 = vpop.xlane.xlu0 %630 }
  0xfa   : > { %2654 = vst [vmem:[#allocation11_spill] sm:$0xff] %v2323_v1  ;;  %2655 = vst [vmem:[#allocation12_spill] sm:$0xff] %v2326_v55  ;;  %v2341_v2 = vsel %vm371_vm3, %v1009_v51, %v1011_v19  ;;  %v2344_v45 = vsel %vm406_vm4, %v1132_v21, %v1133_v17  ;;  %v2347_v9 = vsel %vm406_vm4, %v1133_v17, %v1135_v31  ;;  %v679_v29 = vrot.slane %v633_v61, 6  ;;  %v637_v61 = vpop.xlane.xlu1 %636 }
  0xfb   : > { %2656 = vst [vmem:[#allocation13_spill] sm:$0xff] %v2329_v0  ;;  %2657 = vst [vmem:[#allocation14_spill] sm:$0xff] %v2332_v40  ;;  %v2350_v4 = vsel %vm441_vm6, %v1256_v58, %v1257_v8  ;;  %v2354_v47 = vmul.f32 %v2157_v24, %v2320_v59  ;;  %v2357_v12 = vsel %vm441_vm6, %v1257_v8, %v1259_v5  ;;  %v2665_v17 = vrot.slane %v2233_v57, 1 }
  0xfc   : > { %2658 = vst [vmem:[#allocation15_spill] sm:$0xff] %v2344_v45  ;;  %2659 = vst [vmem:[#allocation16_spill] sm:$0xff] %v2347_v9  ;;  %v2360_v52 = vmul.f32 %v2164_v20, %v749_v14  ;;  %v2364_v23 = vmul.f32 %v2157_v24, %v2332_v40  ;;  %v2666_v31 = vrot.slane %v2184_v30, 1  ;;  %v2376_v14 = vmul.f32 %v2159_v50, %v2320_v59 }
  0xfd   : > { %2660 = vst [vmem:[#allocation17_spill] sm:$0xff] %v2350_v4  ;;  %2661 = vst [vmem:[#allocation18_spill] sm:$0xff] %v2354_v47  ;;  %v2380_v24 = vmul.f32 %v2167_v35, %v2320_v59  ;;  %v2384_v30 = vmul.f32 %v2167_v35, %v2332_v40  ;;  %v2388_v57 = vmul.f32 %v2159_v50, %v2332_v40  ;;  %v706_v21 = vsel %vm297_vm1, %v679_v29, 0.0 }
  0xfe   : > { %2662 = vst [vmem:[#allocation19_spill] sm:$0xff] %v2357_v12  ;;  %2663 = vst [vmem:[#allocation20_spill] sm:$0xff] %v2360_v52  ;;  %v876_v60 = vsel %vm336_vm2, %v2666_v31, %v2665_v17  ;;  %v2392_v8 = vmul.f32 %v2162_v54, %v2320_v59  ;;  %v2397_v51 = vmul.f32 %v2162_v54, %v2332_v40  ;;  %v678_v58 = vrot.slane %v631_v34, 6 }
  0xff   : > { %2664 = vst [vmem:[#allocation21_spill] sm:$0xff] %v2364_v23  ;;  %2667 = vst [vmem:[#allocation22_spill] sm:$0xff] %v2376_v14  ;;  %v790_v17 = vmul.f32 %v2169_v16, %v706_v21  ;;  %v914_v50 = vmul.f32 %v2175_v56, %v706_v21  ;;  %v1038_v31 = vmul.f32 %v2186_v7, %v706_v21  ;;  %v682_v52 = vrot.slane %v637_v61, 6  ;;  %v635_v23 = vpop.xlane.xlu0 %634 }
 0x100   : > { %2668 = vst [vmem:[#allocation23_spill] sm:$0xff] %v2392_v8  ;;  %2669 = vst [vmem:[#allocation24_spill] sm:$0xff] %v2397_v51  ;;  %v1162_v41 = vmul.f32 %v2199_v13, %v706_v21  ;;  %v680_v19 = vsel %vm297_vm1, %v678_v58, %v679_v29  ;;  %v702_v54 = vsel %vm297_vm1, 0.0, %v678_v58 }
 0x101   : > { %v815_v38 = vrot.slane %v790_v17, 1  ;;  %v939_v0 = vrot.slane %v914_v50, 2  ;;  %v1063_v34 = vrot.slane %v1038_v31, 3  ;;  %v752_v35 = vmul.f32 %v2201_v11, %v702_v54 }
 0x102   : > { %v753_v51 = vmul.f32 %v2201_v11, %v680_v19  ;;  %v788_v8 = vmul.f32 %v2169_v16, %v702_v54  ;;  %v789_v55 = vmul.f32 %v2169_v16, %v680_v19  ;;  %v912_v5 = vmul.f32 %v2175_v56, %v702_v54 }
 0x103   : > { %v913_v21 = vmul.f32 %v2175_v56, %v680_v19  ;;  %v1036_v29 = vmul.f32 %v2186_v7, %v702_v54  ;;  %v1037_v58 = vmul.f32 %v2186_v7, %v680_v19  ;;  %v778_v17 = vadd.f32 %v2205_v42, %v752_v35 }
 0x104   : > { %v779_v61 = vadd.f32 %v2249_v28, %v753_v51  ;;  %v812_v50 = vrot.slane %v788_v8, 1  ;;  %v813_v31 = vrot.slane %v789_v55, 1  ;;  %v936_v14 = vrot.slane %v912_v5, 2 }
 0x105   : > { %v937_v40 = vrot.slane %v913_v21, 2  ;;  %v1060_v20 = vrot.slane %v1036_v29, 3  ;;  %v1061_v59 = vrot.slane %v1037_v58, 3  ;;  %v1160_v1 = vmul.f32 %v2199_v13, %v702_v54 }
 0x106   : > { %v814_v12 = vsel %vm336_vm2, %v812_v50, %v813_v31  ;;  %v816_v4 = vsel %vm336_vm2, %v813_v31, %v815_v38  ;;  %v1161_v47 = vmul.f32 %v2199_v13, %v680_v19  ;;  %v1187_v9 = vrot.slane %v1162_v41, 4 }
 0x107   : > { %v840_v45 = vadd.f32 %v814_v12, %v778_v17  ;;  %v841_v42 = vadd.f32 %v816_v4, %v779_v61  ;;  %v2670_v28 = vrot.slane %v2212_v6, 1  ;;  %v2671_v55 = vrot.slane %v2172_v27, 1 }
 0x108   : > { %v938_v8 = vsel %vm371_vm3, %v936_v14, %v937_v40  ;;  %v940_v51 = vsel %vm371_vm3, %v937_v40, %v939_v0  ;;  %v1184_v35 = vrot.slane %v1160_v1, 4  ;;  %v1185_v38 = vrot.slane %v1161_v47, 4 }
 0x109   : > { %v881_v5 = vsel %vm336_vm2, %v2671_v55, %v2670_v28  ;;  %v902_v21 = vadd.f32 %v876_v60, %v840_v45  ;;  %v903_v54 = vadd.f32 %v2275_v49, %v841_v42  ;;  %v707_v19 = vsel %vm297_vm1, %v682_v52, 0.0 }
 0x10a   : > { %v681_v41 = vrot.slane %v635_v23, 6  ;;  %v1062_v4 = vsel %vm406_vm4, %v1060_v20, %v1061_v59  ;;  %v1064_v6 = vsel %vm406_vm4, %v1061_v59, %v1063_v34  ;;  %v793_v27 = vmul.f32 %v2169_v16, %v707_v19 }
 0x10b   : > { %v917_v12 = vmul.f32 %v2175_v56, %v707_v19  ;;  %v964_v29 = vadd.f32 %v938_v8, %v902_v21  ;;  %v965_v14 = vadd.f32 %v940_v51, %v903_v54  ;;  %v1186_v0 = vsel %vm441_vm6, %v1184_v35, %v1185_v38  ;;  %v639_v21 = vpop.xlane.xlu0 %638 }
 0x10c   : > { %v1188_v1 = vsel %vm441_vm6, %v1185_v38, %v1187_v9  ;;  %v1041_v49 = vmul.f32 %v2186_v7, %v707_v19  ;;  %v2439_v40 = vmul.f32 %v2199_v13, %v707_v19  ;;  %v683_v20 = vsel %vm297_vm1, %v681_v41, %v682_v52  ;;  %v641_v38 = vpop.xlane.xlu1 %640 }
 0x10d   : > { %v703_v59 = vsel %vm297_vm1, 0.0, %v681_v41  ;;  %v1026_v45 = vadd.f32 %v2278_v43, %v964_v29  ;;  %v1027_v47 = vadd.f32 %v2281_v48, %v965_v14  ;;  %v820_v23 = vrot.slane %v793_v27, 1 }
 0x10e   : > { %v944_v60 = vrot.slane %v917_v12, 2  ;;  %v754_v34 = vmul.f32 %v2201_v11, %v703_v59  ;;  %v755_v9 = vmul.f32 %v2201_v11, %v683_v20  ;;  %v791_v58 = vmul.f32 %v2169_v16, %v703_v59 }
 0x10f   : > { %v792_v17 = vmul.f32 %v2169_v16, %v683_v20  ;;  %v1088_v61 = vadd.f32 %v1062_v4, %v1026_v45  ;;  %v1089_v50 = vadd.f32 %v1064_v6, %v1027_v47  ;;  %v915_v52 = vmul.f32 %v2175_v56, %v703_v59 }
 0x110   : > { %v916_v31 = vmul.f32 %v2175_v56, %v683_v20  ;;  %v780_v43 = vadd.f32 %v2197_v63, %v754_v34  ;;  %v781_v48 = vadd.f32 %v2230_v32, %v755_v9  ;;  %v817_v42 = vrot.slane %v791_v58, 1 }
 0x111   : > { %v818_v28 = vrot.slane %v792_v17, 1  ;;  %v1150_v55 = vadd.f32 %v2284_v46, %v1088_v61  ;;  %v1151_v8 = vadd.f32 %v2287_v62, %v1089_v50  ;;  %v941_v51 = vrot.slane %v915_v52, 2 }
 0x112   : > { %v942_v35 = vrot.slane %v916_v31, 2  ;;  %v1039_v41 = vmul.f32 %v2186_v7, %v703_v59  ;;  %v1040_v63 = vmul.f32 %v2186_v7, %v683_v20  ;;  %v1068_v46 = vrot.slane %v1041_v49, 3 }
 0x113   : > { %v819_v54 = vsel %vm336_vm2, %v817_v42, %v818_v28  ;;  %v821_v19 = vsel %vm336_vm2, %v818_v28, %v820_v23  ;;  %v1212_v32 = vadd.f32 %v1186_v0, %v1150_v55  ;;  %v1213_v4 = vadd.f32 %v1188_v1, %v1151_v8 }
 0x114   : > { %v842_v6 = vadd.f32 %v819_v54, %v780_v43  ;;  %v843_v27 = vadd.f32 %v821_v19, %v781_v48  ;;  %v1192_v62 = vrot.slane %v2439_v40, 4  ;;  %v1065_v12 = vrot.slane %v1039_v41, 3 }
 0x115   : > { %v1066_v29 = vrot.slane %v1040_v63, 3  ;;  %v1274_v14 = vadd.f32 %v2304_v18, %v1212_v32  ;;  %v1275_v45 = vadd.f32 %v2307_v53, %v1213_v4  ;;  %v943_v47 = vsel %vm371_vm3, %v941_v51, %v942_v35  ;;  %v2477_v53 = vpop.xlane.xlu1 %644 }
 0x116   : > { %v904_v0 = vadd.f32 %v881_v5, %v842_v6  ;;  %v905_v1 = vadd.f32 %v2243_v22, %v843_v27  ;;  %v945_v23 = vsel %vm371_vm3, %v942_v35, %v944_v60  ;;  %v1163_v34 = vmul.f32 %v2199_v13, %v703_v59  ;;  %v2479_v5 = vpop.xlane.xlu0 %642 }
 0x117   : > { %v1164_v9 = vmul.f32 %v2199_v13, %v683_v20  ;;  %1283 = vst.msk [vmem:[%s2463_s13] sm:$0xff] %vm1282_vm7, %v1274_v14  ;;  %1284 = vst.msk [vmem:[%s2463_s13 + $0x8] sm:$0xff] %vm1282_vm7, %v1275_v45  ;;  %v685_v18 = vrot.slane %v641_v38, 6  ;;  %v684_v58 = vrot.slane %v639_v21, 6  ;;  %v1067_v22 = vsel %vm406_vm4, %v1065_v12, %v1066_v29  ;;  %v2672_v45 = vld [vmem:[#allocation9_spill] sm:$0xff] }
 0x118   : > { %v966_v49 = vadd.f32 %v943_v47, %v904_v0  ;;  %v967_v40 = vadd.f32 %v945_v23, %v905_v1  ;;  %v1069_v60 = vsel %vm406_vm4, %v1066_v29, %v1068_v46  ;;  %v1189_v17 = vrot.slane %v1163_v34, 4 }
 0x119   : > { %v1190_v59 = vrot.slane %v1164_v9, 4  ;;  %v708_v50 = vsel %vm297_vm1, %v685_v18, 0.0  ;;  %v686_v52 = vsel %vm297_vm1, %v684_v58, %v685_v18  ;;  %v688_v48 = vrot.slane %v2477_v53, 6 }
 0x11a   : > { %v1028_v20 = vadd.f32 %v2246_v25, %v966_v49  ;;  %v1029_v61 = vadd.f32 %v2255_v37, %v967_v40  ;;  %v796_v31 = vmul.f32 %v2169_v16, %v708_v50  ;;  %v920_v43 = vmul.f32 %v2175_v56, %v708_v50 }
 0x11b   : > { %v687_v42 = vrot.slane %v2479_v5, 6  ;;  %v1191_v8 = vsel %vm441_vm6, %v1189_v17, %v1190_v59  ;;  %v1193_v25 = vsel %vm441_vm6, %v1190_v59, %v1192_v62  ;;  %v1044_v37 = vmul.f32 %v2186_v7, %v708_v50 }
 0x11c   : > { %v1090_v28 = vadd.f32 %v1067_v22, %v1028_v20  ;;  %v1091_v55 = vadd.f32 %v1069_v60, %v1029_v61  ;;  %v1168_v51 = vmul.f32 %v2199_v13, %v708_v50  ;;  %v704_v35 = vsel %vm297_vm1, 0.0, %v684_v58 }
 0x11d   : > { %v757_v38 = vmul.f32 %v2201_v11, %v686_v52  ;;  %v825_v19 = vrot.slane %v796_v31, 1  ;;  %v949_v41 = vrot.slane %v920_v43, 2  ;;  %v756_v63 = vmul.f32 %v2201_v11, %v704_v35 }
 0x11e   : > { %v1152_v21 = vadd.f32 %v2258_v36, %v1090_v28  ;;  %v1153_v54 = vadd.f32 %v2261_v10, %v1091_v55  ;;  %v794_v4 = vmul.f32 %v2169_v16, %v704_v35  ;;  %v795_v6 = vmul.f32 %v2169_v16, %v686_v52 }
 0x11f   : > { %v783_v32 = vadd.f32 %v2314_v44, %v757_v38  ;;  %v918_v62 = vmul.f32 %v2175_v56, %v704_v35  ;;  %v919_v36 = vmul.f32 %v2175_v56, %v686_v52  ;;  %v782_v10 = vadd.f32 %v2311_v33, %v756_v63 }
 0x120   : > { %v1214_v27 = vadd.f32 %v1191_v8, %v1152_v21  ;;  %v1215_v46 = vadd.f32 %v1193_v25, %v1153_v54  ;;  %v822_v12 = vrot.slane %v794_v4, 1  ;;  %v823_v29 = vrot.slane %v795_v6, 1 }
 0x121   : > { %v1042_v14 = vmul.f32 %v2186_v7, %v704_v35  ;;  %v1073_v1 = vrot.slane %v1044_v37, 3  ;;  %v946_v47 = vrot.slane %v918_v62, 2  ;;  %v947_v9 = vrot.slane %v919_v36, 2  ;;  %v2674_v62 = vld [vmem:[#allocation16_spill] sm:$0xff] }
 0x122   : > { %v1276_v44 = vadd.f32 %v2264_v39, %v1214_v27  ;;  %v1277_v0 = vadd.f32 %v2672_v45, %v1215_v46  ;;  %v824_v23 = vsel %vm336_vm2, %v822_v12, %v823_v29  ;;  %v826_v34 = vsel %vm336_vm2, %v823_v29, %v825_v19  ;;  %v2673_v27 = vld [vmem:[#allocation15_spill] sm:$0xff]  ;;  %v2675_v45 = vld [vmem:[#allocation21_spill] sm:$0xff] }
 0x123   : > { %v1043_v49 = vmul.f32 %v2186_v7, %v686_v52  ;;  %v1197_v33 = vrot.slane %v1168_v51, 4  ;;  %v844_v40 = vadd.f32 %v824_v23, %v782_v10  ;;  %v845_v18 = vadd.f32 %v826_v34, %v783_v32  ;;  %v2679_v34 = vld [vmem:[#allocation11_spill] sm:$0xff] }
 0x124   : > { %1285 = vst.msk [vmem:[%s2463_s13 + $0x10] sm:$0xff] %vm1282_vm7, %v1276_v44  ;;  %1286 = vst.msk [vmem:[%s2463_s13 + $0x18] sm:$0xff] %vm1282_vm7, %v1277_v0  ;;  %v1070_v58 = vrot.slane %v1042_v14, 3  ;;  %v1166_v5 = vmul.f32 %v2199_v13, %v704_v35  ;;  %v1167_v22 = vmul.f32 %v2199_v13, %v686_v52  ;;  %v709_v60 = vsel %vm297_vm1, %v688_v48, 0.0 }
 0x125   : > { %v1071_v39 = vrot.slane %v1043_v49, 3  ;;  %v906_v17 = vadd.f32 %v2317_v26, %v844_v40  ;;  %v907_v59 = vadd.f32 %v2335_v3, %v845_v18  ;;  %v799_v20 = vmul.f32 %v2169_v16, %v709_v60  ;;  %v2682_v18 = vld [vmem:[#allocation17_spill] sm:$0xff] }
 0x126   : > { %v923_v61 = vmul.f32 %v2175_v56, %v709_v60  ;;  %v948_v50 = vsel %vm371_vm3, %v946_v47, %v947_v9  ;;  %v950_v31 = vsel %vm371_vm3, %v947_v9, %v949_v41  ;;  %v1194_v43 = vrot.slane %v1166_v5, 4 }
 0x127   : > { %v1195_v28 = vrot.slane %v1167_v22, 4  ;;  %v1014_v52 = vrot.slane %v2388_v57, 2  ;;  %v968_v55 = vadd.f32 %v948_v50, %v906_v17  ;;  %v969_v8 = vadd.f32 %v950_v31, %v907_v59 }
 0x128   : > { %v1072_v25 = vsel %vm406_vm4, %v1070_v58, %v1071_v39  ;;  %v1074_v26 = vsel %vm406_vm4, %v1071_v39, %v1073_v1  ;;  %v830_v37 = vrot.slane %v799_v20, 1  ;;  %v954_v51 = vrot.slane %v923_v61, 2  ;;  %v2677_v1 = vld [vmem:[#allocation18_spill] sm:$0xff]  ;;  %v2683_v39 = vld [vmem:[#allocation19_spill] sm:$0xff] }
 0x129   : > { %v1196_v3 = vsel %vm441_vm6, %v1194_v43, %v1195_v28  ;;  %v1030_v35 = vadd.f32 %v2338_v15, %v968_v55  ;;  %v1031_v38 = vadd.f32 %v2341_v2, %v969_v8  ;;  %v689_v21 = vsel %vm297_vm1, %v687_v42, %v688_v48  ;;  %v2684_v8 = vld [vmem:[#allocation10_spill] sm:$0xff] }
 0x12a   : > { %v705_v57 = vsel %vm297_vm1, 0.0, %v687_v42  ;;  %v1198_v54 = vsel %vm441_vm6, %v1195_v28, %v1197_v33  ;;  %v1047_v19 = vmul.f32 %v2186_v7, %v709_v60  ;;  %v759_v63 = vmul.f32 %v2201_v11, %v689_v21 }
 0x12b   : > { %v758_v41 = vmul.f32 %v2201_v11, %v705_v57  ;;  %v1092_v32 = vadd.f32 %v1072_v25, %v1030_v35  ;;  %v1093_v4 = vadd.f32 %v1074_v26, %v1031_v38  ;;  %v797_v15 = vmul.f32 %v2169_v16, %v705_v57  ;;  %v2685_v25 = vld [vmem:[#allocation8_spill] sm:$0xff]  ;;  %v2687_v38 = vld [vmem:[#allocation22_spill] sm:$0xff] }
 0x12c   : > { %v798_v2 = vmul.f32 %v2169_v16, %v689_v21  ;;  %v785_v48 = vadd.f32 %v2384_v30, %v759_v63  ;;  %v921_v42 = vmul.f32 %v2175_v56, %v705_v57  ;;  %v922_v6 = vmul.f32 %v2175_v56, %v689_v21 }
 0x12d   : > { %v784_v53 = vadd.f32 %v2380_v24, %v758_v41  ;;  %v1154_v46 = vadd.f32 %v2673_v27, %v1092_v32  ;;  %v1155_v36 = vadd.f32 %v2674_v62, %v1093_v4  ;;  %v827_v10 = vrot.slane %v797_v15, 1  ;;  %v2691_v32 = vld [vmem:[#allocation23_spill] sm:$0xff]  ;;  %v2692_v4 = vld [vmem:[#allocation24_spill] sm:$0xff] }
 0x12e   : > { %v828_v11 = vrot.slane %v798_v2, 1  ;;  %v951_v12 = vrot.slane %v921_v42, 2  ;;  %v952_v29 = vrot.slane %v922_v6, 2  ;;  %v1045_v14 = vmul.f32 %v2186_v7, %v705_v57  ;;  %v2693_v27 = vld [vmem:[#allocation20_spill] sm:$0xff] }
 0x12f   : > { %v1046_v16 = vmul.f32 %v2186_v7, %v689_v21  ;;  %v1216_v44 = vadd.f32 %v1196_v3, %v1154_v46  ;;  %v1217_v24 = vadd.f32 %v1198_v54, %v1155_v36  ;;  %v2676_v0 = vrot.slane %v2675_v45, 1 }
 0x130   : > { %v829_v30 = vsel %vm336_vm2, %v827_v10, %v828_v11  ;;  %v831_v56 = vsel %vm336_vm2, %v828_v11, %v830_v37  ;;  %v2678_v47 = vrot.slane %v2677_v1, 1  ;;  %v2680_v9 = vrot.slane %v2679_v34, 1  ;;  %v2694_v10 = vld [vmem:[#allocation13_spill] sm:$0xff] }
 0x131   : > { %v2681_v49 = vmov %v2676_v0  ;;  %v846_v33 = vadd.f32 %v829_v30, %v784_v53  ;;  %v847_v40 = vadd.f32 %v831_v56, %v785_v48  ;;  %v1278_v58 = vadd.f32 %v2682_v18, %v1216_v44 }
 0x132   : > { %v891_v23 = vsel %vm336_vm2, %v2678_v47, %v2676_v0  ;;  %v893_v7 = vsel %vm336_vm2, %v2681_v49, %v2680_v9  ;;  %v1279_v5 = vadd.f32 %v2683_v39, %v1217_v24  ;;  %v1078_v22 = vrot.slane %v1047_v19, 3  ;;  %v2689_v19 = vld [vmem:[#allocation12_spill] sm:$0xff] }
 0x133   : > { %v1171_v17 = vmul.f32 %v2199_v13, %v709_v60  ;;  %v908_v59 = vadd.f32 %v891_v23, %v846_v33  ;;  %v909_v20 = vadd.f32 %v893_v7, %v847_v40  ;;  %v953_v61 = vsel %vm371_vm3, %v951_v12, %v952_v29  ;;  %1287 = vst.msk [vmem:[%s2463_s13 + $0x20] sm:$0xff] %vm1282_vm7, %v1278_v58  ;;  %v2686_v60 = vld [vmem:[#allocation14_spill] sm:$0xff] }
 0x134   : > { %v955_v50 = vsel %vm371_vm3, %v952_v29, %v954_v51  ;;  %1288 = vst.msk [vmem:[%s2463_s13 + $0x28] sm:$0xff] %vm1282_vm7, %v1279_v5  ;;  %v1075_v31 = vrot.slane %v1045_v14, 3  ;;  %v1076_v43 = vrot.slane %v1046_v16, 3  ;;  %v1169_v28 = vmul.f32 %v2199_v13, %v705_v57 }
 0x135   : > { %v1170_v55 = vmul.f32 %v2199_v13, %v689_v21  ;;  %v1231_v26 = vmul.f32 %v2685_v25, %v2684_v8  ;;  %v1232_v3 = vmul.f32 %v2685_v25, %v2686_v60  ;;  %v970_v37 = vadd.f32 %v953_v61, %v908_v59 }
 0x136   : > { %v971_v35 = vadd.f32 %v955_v50, %v909_v20  ;;  %v2688_v51 = vrot.slane %v2687_v38, 2  ;;  %v2690_v41 = vrot.slane %v2689_v19, 2  ;;  %v1137_v57 = vrot.slane %v2691_v32, 3 }
 0x137   : > { %v1138_v13 = vrot.slane %v2692_v4, 3  ;;  %v1202_v21 = vrot.slane %v1171_v17, 4  ;;  %v1077_v53 = vsel %vm406_vm4, %v1075_v31, %v1076_v43  ;;  %v1079_v48 = vsel %vm406_vm4, %v1076_v43, %v1078_v22 }
 0x138   : > { %v1015_v54 = vsel %vm371_vm3, %v2688_v51, %v1014_v52  ;;  %v1017_v63 = vsel %vm371_vm3, %v1014_v52, %v2690_v41  ;;  %v1199_v42 = vrot.slane %v1169_v28, 4  ;;  %v1200_v6 = vrot.slane %v1170_v55, 4 }
 0x139   : > { %v1032_v15 = vadd.f32 %v1015_v54, %v970_v37  ;;  %v1033_v2 = vadd.f32 %v1017_v63, %v971_v35  ;;  %v1264_v46 = vrot.slane %v2693_v27, 4  ;;  %v1139_v52 = vsel %vm406_vm4, %v1137_v57, %v1138_v13 }
 0x13a   : > { %v2695_v11 = vrot.slane %v2694_v10, 3  ;;  %v1261_v29 = vrot.slane %v1231_v26, 4  ;;  %v1262_v14 = vrot.slane %v1232_v3, 4  ;;  %v1201_v24 = vsel %vm441_vm6, %v1199_v42, %v1200_v6 }
 0x13b   : > { %v1094_v62 = vadd.f32 %v1077_v53, %v1032_v15  ;;  %v1095_v36 = vadd.f32 %v1079_v48, %v1033_v2  ;;  %v1203_v30 = vsel %vm441_vm6, %v1200_v6, %v1202_v21 }
 0x13c   : > { %v1141_v12 = vsel %vm406_vm4, %v1138_v13, %v2695_v11  ;;  %v1263_v0 = vsel %vm441_vm6, %v1261_v29, %v1262_v14  ;;  %v1265_v1 = vsel %vm441_vm6, %v1262_v14, %v1264_v46 }
 0x13d   : > { %v1156_v16 = vadd.f32 %v1139_v52, %v1094_v62  ;;  %v1157_v44 = vadd.f32 %v1141_v12, %v1095_v36 }
 0x13f   : > { %v1218_v56 = vadd.f32 %v1201_v24, %v1156_v16  ;;  %v1219_v45 = vadd.f32 %v1203_v30, %v1157_v44 }
 0x141   : > { %v1280_v47 = vadd.f32 %v1263_v0, %v1218_v56  ;;  %v1281_v23 = vadd.f32 %v1265_v1, %v1219_v45 }
 0x143   : > { %1289 = vst.msk [vmem:[%s2463_s13 + $0x30] sm:$0xff] %vm1282_vm7, %v1280_v47  ;;  %1290 = vst.msk [vmem:[%s2463_s13 + $0x38] sm:$0xff] %vm1282_vm7, %v1281_v23 }
 0x144 PF: > { %p16_p13 = scmp.ge.s32.totalorder %s1671_s20, 4   ;;  %s2696_s15 = smov %s1610_s16 }
 0x145   : > { %s2697_s16 = smov %s1614_s17  ;;  %s2698_s17 = smov %s1681_s23 }
 0x146   : > { %s2699_s18 = smov %s1671_s20  ;;  %18 = sbr.rel (!%p16_p13) target bundleno = 4 (0x4), region = 97 }
 0x14d   :  { %1342 = vsyncpa [#allocation3], 1 }
 0x14e   :  { %1344 = vsyncpa [#allocation3 + $0x1], 1 }
 0x14f   :  { %1345 = vsyncpa [#allocation4], 1 }
 0x150   :  { %1347 = vsyncpa [#allocation4 + $0x1], 1 }

</bundles_post_ra>
